<compile_context>
chip_gen: v7x
topology: tpu7x:2x2x1
jax: 0.10.0
libtpu: 0.0.40
codegen_flags: <defaults>
</compile_context>

<pallas_src>
import math

import jax
import jax.numpy as jnp
from jax import lax
from jax.experimental import pallas as pl
from jax.experimental.pallas import tpu as pltpu

LANE = 128
SUBLANE = 8


def _round_up(n, m):
    return ((n + m - 1) // m) * m


def _vmem_limit_bytes():
    """~3/4 of the chip's VMEM (128 MiB on v5e/v6e, 64 MiB on v7x), clamped to 32..96 MiB."""
    try:
        cap = pltpu.get_tpu_info().vmem_capacity_bytes
    except Exception:
        cap = 64 * 1024 * 1024
    return int(min(96 * 1024 * 1024, max(32 * 1024 * 1024, (3 * cap) // 4)))


def _pick_batch_block(Bp, cap=32):
    """Largest divisor of the sublane-padded batch <= cap, preferring bf16-tile-aligned
    (multiple of 16) blocks, and splitting in two when possible (v7x second core)."""
    if Bp <= cap:
        if Bp % 32 == 0:
            return Bp // 2
        return Bp
    for d in range(cap, 0, -1):
        if Bp % d == 0 and d % 16 == 0:
            return d
    for d in range(cap, 0, -1):
        if Bp % d == 0 and d % SUBLANE == 0:
            return d
    return Bp


def _pick_time_chunk(T, Bb, d_in, Hp, x_bytes, vmem_budget):
    """Largest divisor Tt of T that fits the per-chunk VMEM budget (double-buffered x/out
    blocks + f32 gi scratch), capped at 256."""
    per_t = Bb * (2 * x_bytes * d_in + 2 * 2 * Hp + 4 * 3 * Hp)
    cap = max(1, min(256, vmem_budget // max(per_t, 1)))
    for d in range(min(T, cap), 0, -1):
        if T % d == 0:
            return d
    return 1


# --------------------------------------------------------------------------------------
# Kernel 1: one GRU layer (PyTorch gate ordering r, z, n).
# Grid = (batch blocks ["parallel"], time chunks ["arbitrary" -- serial recurrence]).
#   x_ref:   (Tt, Bb, Din)            input chunk (f32 for layer 0, bf16 afterwards)
#   wih_ref: (Din, 3*Hp) bf16         pre-transposed, per-gate lane-padded
#   whh_ref: (Hp, 3*Hp)  bf16         pre-transposed, per-gate lane-padded
#   bih/bhh: (1, 3*Hp)   f32
#   out_ref: (Tt, Bb, Hp) bf16        lane-dense output
#   h_ref:   (Bb, Hp) f32 scratch     recurrent state (persists across time chunks)
#   gi_ref:  (Tt, Bb, 3*Hp) f32       hoisted input projection for the chunk
# --------------------------------------------------------------------------------------
def gru_layer_kernel(x_ref, wih_ref, whh_ref, bih_ref, bhh_ref, out_ref, h_ref, gi_ref):
    Tt, Bb, Hp = out_ref.shape
    Din = x_ref.shape[-1]

    @pl.when(pl.program_id(1) == 0)
    def _():
        h_ref[...] = jnp.zeros_like(h_ref)  # h_0 = 0, matching nn.GRU default

    # Hoisted input projection: ONE MXU matmul for the whole (time chunk, batch block).
    x_flat = x_ref[...].reshape(Tt * Bb, Din).astype(jnp.bfloat16)
    gi = jnp.dot(x_flat, wih_ref[...], preferred_element_type=jnp.float32) + bih_ref[...]
    gi_ref[...] = gi.reshape(Tt, Bb, 3 * Hp)

    w_hh = whh_ref[...]
    # Hoisted bias broadcast (JAX does not CSE broadcast_in_dim inside the unrolled loop).
    b_hh = jnp.broadcast_to(bhh_ref[...], (Bb, 3 * Hp))

    def step(t, carry):
        h_prev = h_ref[...]                                               # (Bb, Hp) f32
        gh = jnp.dot(h_prev.astype(jnp.bfloat16), w_hh,
                     preferred_element_type=jnp.float32) + b_hh           # (Bb, 3Hp)
        gi_t = gi_ref[t]                                                  # aligned view

        # Per-gate lane-padded layout: each gate occupies a full [g*Hp, (g+1)*Hp) slab,
        # so these slices are 128-lane-aligned (unmasked vreg ops).
        i_r, i_z, i_n = gi_t[:, :Hp], gi_t[:, Hp:2 * Hp], gi_t[:, 2 * Hp:]
        h_r, h_z, h_n = gh[:, :Hp], gh[:, Hp:2 * Hp], gh[:, 2 * Hp:]

        r = jax.nn.sigmoid(i_r + h_r)
        z = jax.nn.sigmoid(i_z + h_z)
        n = jnp.tanh(i_n + r * h_n)
        h_new = (1.0 - z) * n + z * h_prev

        h_ref[...] = h_new
        out_ref[t] = h_new.astype(out_ref.dtype)                          # lane-dense store
        return carry

    # Serial recurrence: (partially) unroll so gi loads, bf16 casts, gate VPU math and
    # output stores co-issue under the recurrent matmul latency.
    lax.fori_loop(0, Tt, step, 0, unroll=(Tt if Tt <= 16 else 8))


def gru_layer(x_tm, wih_t, whh_t, b_ih, b_hh, vmem_limit):
    # x_tm: (T, Bp, Din) time-major.  Returns (T, Bp, Hp) bf16.
    T, Bp, Din = x_tm.shape
    Hp = whh_t.shape[0]
    Bb = _pick_batch_block(Bp)
    nb = Bp // Bb
    x_bytes = jnp.dtype(x_tm.dtype).itemsize
    Tt = _pick_time_chunk(T, Bb, Din, Hp, x_bytes, vmem_limit // 2)
    nt = T // Tt

    cost = pl.CostEstimate(
        flops=int(2 * T * Bp * 3 * Hp * (Din + Hp)),
        transcendentals=int(3 * T * Bp * Hp),
        bytes_accessed=int(x_bytes * T * Bp * Din + 2 * T * Bp * Hp
                           + 2 * 3 * Hp * (Din + Hp) + 8 * 3 * Hp),
    )

    # TODO(synk): grid-invariant weight/bias blocks could use pipeline_mode=pl.Buffered(1)
    # to skip their second VMEM copy (matters at production D/H against v7x's 64 MiB).
    return pl.pallas_call(
        gru_layer_kernel,
        out_shape=jax.ShapeDtypeStruct((T, Bp, Hp), jnp.bfloat16),
        grid=(nb, nt),
        in_specs=[
            pl.BlockSpec((Tt, Bb, Din), lambda bi, ti: (ti, bi, 0)),
            pl.BlockSpec((Din, 3 * Hp), lambda bi, ti: (0, 0)),
            pl.BlockSpec((Hp, 3 * Hp), lambda bi, ti: (0, 0)),
            pl.BlockSpec((1, 3 * Hp), lambda bi, ti: (0, 0)),
            pl.BlockSpec((1, 3 * Hp), lambda bi, ti: (0, 0)),
        ],
        out_specs=pl.BlockSpec((Tt, Bb, Hp), lambda bi, ti: (ti, bi, 0)),
        scratch_shapes=[
            pltpu.VMEM((Bb, Hp), jnp.float32),            # recurrent state h
            pltpu.VMEM((Tt, Bb, 3 * Hp), jnp.float32),    # hoisted input projection
        ],
        compiler_params=pltpu.CompilerParams(
            # Batch blocks are independent ("parallel", v7x megacore); the time axis
            # carries h_ref and MUST stay sequential ("arbitrary").
            dimension_semantics=("parallel", "arbitrary"),
            vmem_limit_bytes=vmem_limit),
        cost_estimate=cost,
    )(x_tm, wih_t, whh_t, b_ih, b_hh)


# --------------------------------------------------------------------------------------
# Kernel 2: fused self-attention + final FC for one batch block per grid step.
#   g_ref:    (T, Bb, Hp) bf16    GRU output, time-major, lane-dense
#   wall_ref: (Hp, 3*Hp + Op) bf16  [Wq/sqrt(H) | Wk | Wv | Wfc_g]  (pre-transposed/padded)
#   ball_ref: (1, 3*Hp + Op) f32    [bq/sqrt(H) | bk | bv | b_fc]
#   wfcc_ref: (Hp, Op) bf16         fc weight for the context half
#   o_ref:    (Bb, T, Op) f32       batch-major, lane-dense output
#   proj_ref: (T, Bb, 3*Hp + Op) f32 scratch for the fused projection
# --------------------------------------------------------------------------------------
def attn_fc_kernel(g_ref, wall_ref, ball_ref, wfcc_ref, o_ref, proj_ref):
    T, Bb, Hp = g_ref.shape
    Ntot = wall_ref.shape[1]

    # ONE wide projection matmul for the whole (T*Bb) block:
    #   [q | k | v | g@Wfc_g + b_fc] = g @ [Wq/s | Wk | Wv | Wfc_g] + [bq/s | bk | bv | b_fc]
    g_flat = g_ref[...].reshape(T * Bb, Hp)                               # free reshape
    proj = jnp.dot(g_flat, wall_ref[...],
                   preferred_element_type=jnp.float32) + ball_ref[...]    # (T*Bb, Ntot)
    proj_ref[...] = proj.reshape(T, Bb, Ntot)

    wfc_c = wfcc_ref[...]

    # Per-batch-element (T, T) score/softmax/context math; the heavy projection matmuls
    # above are already batched over T*Bb rows.
    # TODO(synk): for long T, tile over keys (flash-style online softmax) and switch this
    # static loop to lax.fori_loop to bound the (T, T) live range / VMEM use.
    for b in range(Bb):
        p_b = proj_ref[:, b, :]                                           # (T, Ntot) f32
        q = p_b[:, :Hp].astype(jnp.bfloat16)
        k = p_b[:, Hp:2 * Hp].astype(jnp.bfloat16)
        v = p_b[:, 2 * Hp:3 * Hp].astype(jnp.bfloat16)
        og = p_b[:, 3 * Hp:]                                              # (T, Op) f32

        s = jnp.einsum("qh,kh->qk", q, k,
                       preferred_element_type=jnp.float32)                # 1/sqrt(H) folded
        m = jnp.max(s, axis=-1, keepdims=True)
        p = jnp.exp(s - m)
        denom = jnp.sum(p, axis=-1, keepdims=True)
        attn = (p * pl.reciprocal(denom, approx=True)).astype(jnp.bfloat16)

        ctx = jnp.dot(attn, v, preferred_element_type=jnp.float32)        # (T, Hp)

        # fc(concat([g, ctx])) == g @ Wfc_g + ctx @ Wfc_c + b_fc  (g-term + bias in og)
        out_b = og + jnp.dot(ctx.astype(jnp.bfloat16), wfc_c,
                             preferred_element_type=jnp.float32)          # (T, Op)
        o_ref[b] = out_b


def attention_fc(g_tm, w_all, b_all, wfcc_t, vmem_limit):
    # g_tm: (T, Bp, Hp) bf16 time-major.  Returns (Bp, T, Op) f32 batch-major.
    T, Bp, Hp = g_tm.shape
    Ntot = w_all.shape[1]
    Op = wfcc_t.shape[1]
    Bb = _pick_batch_block(Bp)
    nb = Bp // Bb

    cost = pl.CostEstimate(
        flops=int(2 * Bp * T * Hp * (Ntot + Op) + 4 * Bp * T * T * Hp),
        transcendentals=int(Bp * T * T + Bp * T),
        bytes_accessed=int(2 * T * Bp * Hp + 4 * Bp * T * Op
                           + 2 * Hp * (Ntot + Op) + 4 * Ntot),
    )

    return pl.pallas_call(
        attn_fc_kernel,
        out_shape=jax.ShapeDtypeStruct((Bp, T, Op), jnp.float32),
        grid=(nb,),
        in_specs=[
            pl.BlockSpec((T, Bb, Hp), lambda bi: (0, bi, 0)),
            pl.BlockSpec((Hp, Ntot), lambda bi: (0, 0)),
            pl.BlockSpec((1, Ntot), lambda bi: (0, 0)),
            pl.BlockSpec((Hp, Op), lambda bi: (0, 0)),
        ],
        out_specs=pl.BlockSpec((Bb, T, Op), lambda bi: (bi, 0, 0)),
        scratch_shapes=[pltpu.VMEM((T, Bb, Ntot), jnp.float32)],
        compiler_params=pltpu.CompilerParams(
            dimension_semantics=("parallel",),            # independent batch blocks
            vmem_limit_bytes=vmem_limit),
        cost_estimate=cost,
    )(g_tm, w_all, b_all, wfcc_t)


# --------------------------------------------------------------------------------------
# Parameters: PyTorch-layout init + host-side layout plumbing for the kernels.
# --------------------------------------------------------------------------------------
def init_params(key, input_dim, hidden_dim, num_layers, output_dim):
    params = {}
    k = key

    def draw(k, shape, scale):
        k, sub = jax.random.split(k)
        return k, jax.random.uniform(sub, shape, jnp.float32, -scale, scale)

    s = 1.0 / math.sqrt(hidden_dim)
    gru = []
    for layer in range(num_layers):
        d_in = input_dim if layer == 0 else hidden_dim
        k, w_ih = draw(k, (3 * hidden_dim, d_in), s)
        k, w_hh = draw(k, (3 * hidden_dim, hidden_dim), s)
        k, b_ih = draw(k, (3 * hidden_dim,), s)
        k, b_hh = draw(k, (3 * hidden_dim,), s)
        gru.append(dict(w_ih=w_ih, w_hh=w_hh, b_ih=b_ih, b_hh=b_hh))
    params["gru"] = gru

    for name in ("q", "k", "v"):
        k, w = draw(k, (hidden_dim, hidden_dim), s)
        k, b = draw(k, (hidden_dim,), s)
        params[f"w{name}"] = w
        params[f"b{name}"] = b

    sf = 1.0 / math.sqrt(2 * hidden_dim)
    k, wfc = draw(k, (output_dim, 2 * hidden_dim), sf)
    k, bfc = draw(k, (output_dim,), sf)
    params["wfc"] = wfc
    params["bfc"] = bfc
    return params


def prepare_params(params):
    """Host-side layout plumbing: per-gate lane padding, pre-transpose, pre-split,
    pre-scale (softmax 1/sqrt(H) folded into Wq/bq), fuse [Wq|Wk|Wv|Wfc_g], bf16-cast."""
    H = params["gru"][0]["w_hh"].shape[1]
    O = params["wfc"].shape[0]
    Hp = _round_up(H, LANE)
    Op = _round_up(O, LANE)
    Ntot = 3 * Hp + Op
    scale = math.sqrt(H)
    bf16 = jnp.bfloat16

    prepped = {"gru": [], "out_dim": O}

    for li, layer in enumerate(params["gru"]):
        d_in = layer["w_ih"].shape[1]
        d_in_pad = d_in if li == 0 else Hp           # deeper layers consume padded H
        wih = jnp.zeros((d_in_pad, 3 * Hp), jnp.float32)
        whh = jnp.zeros((Hp, 3 * Hp), jnp.float32)
        bih = jnp.zeros((1, 3 * Hp), jnp.float32)
        bhh = jnp.zeros((1, 3 * Hp), jnp.float32)
        for g in range(3):
            wih = wih.at[:d_in, g * Hp:g * Hp + H].set(layer["w_ih"][g * H:(g + 1) * H, :].T)
            whh = whh.at[:H, g * Hp:g * Hp + H].set(layer["w_hh"][g * H:(g + 1) * H, :].T)
            bih = bih.at[0, g * Hp:g * Hp + H].set(layer["b_ih"][g * H:(g + 1) * H])
            bhh = bhh.at[0, g * Hp:g * Hp + H].set(layer["b_hh"][g * H:(g + 1) * H])
        prepped["gru"].append(dict(wih_t=wih.astype(bf16), whh_t=whh.astype(bf16),
                                   b_ih=bih, b_hh=bhh))

    # Fused attention/FC RHS: [Wq/sqrt(H) | Wk | Wv | Wfc_g], biases [bq/sqrt(H)|bk|bv|b_fc].
    wall = jnp.zeros((Hp, Ntot), jnp.float32)
    ball = jnp.zeros((1, Ntot), jnp.float32)
    wall = wall.at[:H, 0:H].set((params["wq"] / scale).T)
    wall = wall.at[:H, Hp:Hp + H].set(params["wk"].T)
    wall = wall.at[:H, 2 * Hp:2 * Hp + H].set(params["wv"].T)
    wall = wall.at[:H, 3 * Hp:3 * Hp + O].set(params["wfc"][:, :H].T)
    ball = ball.at[0, 0:H].set(params["bq"] / scale)
    ball = ball.at[0, Hp:Hp + H].set(params["bk"])
    ball = ball.at[0, 2 * Hp:2 * Hp + H].set(params["bv"])
    ball = ball.at[0, 3 * Hp:3 * Hp + O].set(params["bfc"])

    wfcc = jnp.zeros((Hp, Op), jnp.float32)
    wfcc = wfcc.at[:H, :O].set(params["wfc"][:, H:].T)

    prepped["w_all"] = wall.astype(bf16)
    prepped["b_all"] = ball
    prepped["wfcc_t"] = wfcc.astype(bf16)
    return prepped


def gru_seq2seq_with_attention(prepped, x):
    # x: (B, T, D_in) float32 (batch_first, like the PyTorch module).
    # TODO(synk): nn.Dropout is identity here (inference semantics); no RNG dropout.
    B, T, _ = x.shape
    Bp = _round_up(B, SUBLANE)
    vmem_limit = _vmem_limit_bytes()

    # Sublane-pad the batch (padded rows are independent garbage, sliced off at the end)
    # and transpose the small raw input once; everything downstream stays in the layout
    # its consumer kernel expects (GRU time-major bf16, attention batch-major f32 out).
    if Bp != B:
        x = jnp.pad(x, ((0, Bp - B), (0, 0), (0, 0)))
    h = jnp.transpose(x, (1, 0, 2))                        # (T, Bp, D_in)

    for layer in prepped["gru"]:
        h = gru_layer(h, layer["wih_t"], layer["whh_t"],
                      layer["b_ih"], layer["b_hh"], vmem_limit)   # (T, Bp, Hp) bf16

    out_pad = attention_fc(h, prepped["w_all"], prepped["b_all"],
                           prepped["wfcc_t"], vmem_limit)         # (Bp, T, Op) f32
    return out_pad[:B, :, :prepped["out_dim"]]


# --------------------------------------------------------------------------------------
# Pure-JAX reference mirroring the kernel numerics (bf16 matmul inputs, f32 accumulation)
# --------------------------------------------------------------------------------------
def reference_forward(params, x):
    bf16 = jnp.bfloat16

    def mm(a, b):
        return jnp.dot(a.astype(bf16), b.astype(bf16),
                       preferred_element_type=jnp.float32)

    B, T, _ = x.shape
    H = params["gru"][0]["w_hh"].shape[1]
    inp = x
    for layer in params["gru"]:
        w_ih, w_hh = layer["w_ih"], layer["w_hh"]
        b_ih, b_hh = layer["b_ih"], layer["b_hh"]

        def step(h, x_t):
            gi = mm(x_t, w_ih.T) + b_ih
            gh = mm(h, w_hh.T) + b_hh
            i_r, i_z, i_n = jnp.split(gi, 3, axis=-1)
            h_r, h_z, h_n = jnp.split(gh, 3, axis=-1)
            r = jax.nn.sigmoid(i_r + h_r)
            z = jax.nn.sigmoid(i_z + h_z)
            n = jnp.tanh(i_n + r * h_n)
            h_new = (1.0 - z) * n + z * h
            return h_new, h_new

        h0 = jnp.zeros((B, H), jnp.float32)
        _, outs = lax.scan(step, h0, jnp.transpose(inp, (1, 0, 2)))
        inp = jnp.transpose(outs, (1, 0, 2))

    g = inp  # (B, T, H)
    q = mm(g, params["wq"].T) + params["bq"]
    k = mm(g, params["wk"].T) + params["bk"]
    v = mm(g, params["wv"].T) + params["bv"]
    scores = jnp.einsum("btd,bsd->bts", q.astype(bf16), k.astype(bf16),
                        preferred_element_type=jnp.float32) / math.sqrt(H)
    attn = jax.nn.softmax(scores, axis=-1)
    context = jnp.einsum("bts,bsd->btd", attn.astype(bf16), v.astype(bf16),
                         preferred_element_type=jnp.float32)
    combined = jnp.concatenate([g, context], axis=-1)
    return mm(combined, params["wfc"].T) + params["bfc"]


if __name__ == "__main__":
    B, T = 2, 8
    input_dim, hidden_dim, num_layers, output_dim = 4, 32, 2, 3

    key = jax.random.PRNGKey(0)
    kx, kp = jax.random.split(key)
    x = jax.random.normal(kx, (B, T, input_dim), jnp.float32)
    params = init_params(kp, input_dim, hidden_dim, num_layers, output_dim)
    prepped = prepare_params(params)

    out = gru_seq2seq_with_attention(prepped, x)
    out = jax.block_until_ready(out)

    ref = reference_forward(params, x)
    assert out.shape == (B, T, output_dim), out.shape
    max_diff = float(jnp.max(jnp.abs(out - ref)))
    assert jnp.allclose(out, ref, atol=2e-2, rtol=2e-2), \
        f"mismatch vs reference (max abs diff {max_diff})"

    print("KERNEL_OK")
</pallas_src>

<mosaic_0001>
module attributes {stable_mosaic.version = 11 : i64} {
  func.func @gru_layer_kernel(%arg0: i32, %arg1: i32, %arg2: memref<8x8x4xf32, #tpu.memory_space<vmem>>, %arg3: memref<4x384xbf16, #tpu.memory_space<vmem>>, %arg4: memref<128x384xbf16, #tpu.memory_space<vmem>>, %arg5: memref<1x384xf32, #tpu.memory_space<vmem>>, %arg6: memref<1x384xf32, #tpu.memory_space<vmem>>, %arg7: memref<8x8x128xbf16, #tpu.memory_space<vmem>>, %arg8: memref<8x128xf32, #tpu.memory_space<vmem>>, %arg9: memref<8x8x384xf32, #tpu.memory_space<vmem>>) attributes {dimension_semantics = [#tpu.dimension_semantics<parallel>, #tpu.dimension_semantics<arbitrary>], iteration_bounds = array<i64: 1, 1>, scalar_prefetch = 0 : i64, scratch_operands = 2 : i64, tpu.core_type = #tpu.core_type<tc>, window_params = [{transform_indices = @transform_0, window_bounds = array<i64: 8, 8, 4>}, {pipeline_mode = #tpu.pipeline_mode<synchronous>, transform_indices = @transform_1, window_bounds = array<i64: 4, 384>}, {pipeline_mode = #tpu.pipeline_mode<synchronous>, transform_indices = @transform_2, window_bounds = array<i64: 128, 384>}, {pipeline_mode = #tpu.pipeline_mode<synchronous>, transform_indices = @transform_3, window_bounds = array<i64: 1, 384>}, {pipeline_mode = #tpu.pipeline_mode<synchronous>, transform_indices = @transform_4, window_bounds = array<i64: 1, 384>}, {transform_indices = @transform_5, window_bounds = array<i64: 8, 8, 128>}]} {
    %c0_i32 = arith.constant 0 : i32
    %0 = arith.cmpi eq, %arg1, %c0_i32 : i32
    %1 = arith.extui %0 : i1 to i32
    %c0_i32_0 = arith.constant 0 : i32
    %2 = arith.cmpi ne, %1, %c0_i32_0 : i32
    scf.if %2 {
      %cst_111 = arith.constant 0.000000e+00 : f32
      %329 = vector.broadcast %cst_111 : f32 to vector<8x128xf32>
      %c0_112 = arith.constant 0 : index
      %c0_113 = arith.constant 0 : index
      %330 = vector.load %arg8[%c0_112, %c0_113] : memref<8x128xf32, #tpu.memory_space<vmem>>, vector<8x128xf32>
      tpu.vector_store %arg8[%c0_112, %c0_113], %329 {strides = array<i32>} : memref<8x128xf32, #tpu.memory_space<vmem>>, vector<8x128xf32>,
    } else {
    }
    %c0 = arith.constant 0 : index
    %c0_1 = arith.constant 0 : index
    %c0_2 = arith.constant 0 : index
    %3 = vector.load %arg2[%c0, %c0_1, %c0_2] : memref<8x8x4xf32, #tpu.memory_space<vmem>>, vector<8x8x4xf32>
    %4 = vector.shape_cast %3 : vector<8x8x4xf32> to vector<64x4xf32>
    %5 = arith.truncf %4 : vector<64x4xf32> to vector<64x4xbf16>
    %c0_3 = arith.constant 0 : index
    %c0_4 = arith.constant 0 : index
    %6 = vector.load %arg3[%c0_3, %c0_4] : memref<4x384xbf16, #tpu.memory_space<vmem>>, vector<4x384xbf16>
    %cst = arith.constant dense<0.000000e+00> : vector<64x384xf32>
    %7 = tpu.matmul %5, %6, %cst {dimension_numbers = #tpu.dot_dimension_numbers<[1], [0], [0], [1], [0, 0, 1, 1], [], []>} : vector<64x4xbf16>, vector<4x384xbf16>, vector<64x384xf32> -> vector<64x384xf32>
    %c0_5 = arith.constant 0 : index
    %c0_6 = arith.constant 0 : index
    %8 = vector.load %arg5[%c0_5, %c0_6] : memref<1x384xf32, #tpu.memory_space<vmem>>, vector<1x384xf32>
    %9 = vector.broadcast %8 : vector<1x384xf32> to vector<64x384xf32>
    %10 = arith.addf %7, %9 : vector<64x384xf32>
    %11 = vector.shape_cast %10 : vector<64x384xf32> to vector<8x8x384xf32>
    %c0_7 = arith.constant 0 : index
    %c0_8 = arith.constant 0 : index
    %c0_9 = arith.constant 0 : index
    %12 = vector.load %arg9[%c0_7, %c0_8, %c0_9] : memref<8x8x384xf32, #tpu.memory_space<vmem>>, vector<8x8x384xf32>
    tpu.vector_store %arg9[%c0_7, %c0_8, %c0_9], %11 {strides = array<i32>} : memref<8x8x384xf32, #tpu.memory_space<vmem>>, vector<8x8x384xf32>,
    %c0_10 = arith.constant 0 : index
    %c0_11 = arith.constant 0 : index
    %13 = vector.load %arg4[%c0_10, %c0_11] : memref<128x384xbf16, #tpu.memory_space<vmem>>, vector<128x384xbf16>
    %c0_12 = arith.constant 0 : index
    %c0_13 = arith.constant 0 : index
    %14 = vector.load %arg6[%c0_12, %c0_13] : memref<1x384xf32, #tpu.memory_space<vmem>>, vector<1x384xf32>
    %15 = vector.shape_cast %14 : vector<1x384xf32> to vector<1x384xf32>
    %16 = vector.broadcast %15 : vector<1x384xf32> to vector<8x384xf32>
    %c0_i32_14 = arith.constant 0 : i32
    %c0_15 = arith.constant 0 : index
    %c0_16 = arith.constant 0 : index
    %17 = vector.load %arg8[%c0_15, %c0_16] : memref<8x128xf32, #tpu.memory_space<vmem>>, vector<8x128xf32>
    %18 = arith.truncf %17 : vector<8x128xf32> to vector<8x128xbf16>
    %cst_17 = arith.constant dense<0.000000e+00> : vector<8x384xf32>
    %19 = tpu.matmul %18, %13, %cst_17 {dimension_numbers = #tpu.dot_dimension_numbers<[1], [0], [0], [1], [0, 0, 1, 1], [], []>} : vector<8x128xbf16>, vector<128x384xbf16>, vector<8x384xf32> -> vector<8x384xf32>
    %20 = arith.addf %19, %16 : vector<8x384xf32>
    %21 = arith.index_cast %c0_i32_14 : i32 to index
    %c0_18 = arith.constant 0 : index
    %c0_19 = arith.constant 0 : index
    %22 = vector.load %arg9[%21, %c0_18, %c0_19] : memref<8x8x384xf32, #tpu.memory_space<vmem>>, vector<1x8x384xf32>
    %23 = vector.shape_cast %22 : vector<1x8x384xf32> to vector<8x384xf32>
    %24 = vector.extract_strided_slice %23 {offsets = [0, 0], sizes = [8, 128], strides = [1, 1]} : vector<8x384xf32> to vector<8x128xf32>
    %25 = vector.extract_strided_slice %23 {offsets = [0, 128], sizes = [8, 128], strides = [1, 1]} : vector<8x384xf32> to vector<8x128xf32>
    %26 = vector.extract_strided_slice %23 {offsets = [0, 256], sizes = [8, 128], strides = [1, 1]} : vector<8x384xf32> to vector<8x128xf32>
    %27 = vector.extract_strided_slice %20 {offsets = [0, 0], sizes = [8, 128], strides = [1, 1]} : vector<8x384xf32> to vector<8x128xf32>
    %28 = vector.extract_strided_slice %20 {offsets = [0, 128], sizes = [8, 128], strides = [1, 1]} : vector<8x384xf32> to vector<8x128xf32>
    %29 = vector.extract_strided_slice %20 {offsets = [0, 256], sizes = [8, 128], strides = [1, 1]} : vector<8x384xf32> to vector<8x128xf32>
    %30 = arith.addf %24, %27 : vector<8x128xf32>
    %31 = arith.negf %30 : vector<8x128xf32>
    %32 = math.exp %31 : vector<8x128xf32>
    %cst_20 = arith.constant 1.000000e+00 : f32
    %33 = vector.broadcast %cst_20 : f32 to vector<8x128xf32>
    %34 = arith.addf %33, %32 : vector<8x128xf32>
    %35 = arith.divf %33, %34 : vector<8x128xf32>
    %36 = arith.addf %25, %28 : vector<8x128xf32>
    %37 = arith.negf %36 : vector<8x128xf32>
    %38 = math.exp %37 : vector<8x128xf32>
    %cst_21 = arith.constant 1.000000e+00 : f32
    %39 = vector.broadcast %cst_21 : f32 to vector<8x128xf32>
    %40 = arith.addf %39, %38 : vector<8x128xf32>
    %41 = arith.divf %39, %40 : vector<8x128xf32>
    %42 = arith.mulf %35, %29 : vector<8x128xf32>
    %43 = arith.addf %26, %42 : vector<8x128xf32>
    %44 = math.tanh %43 : vector<8x128xf32>
    %cst_22 = arith.constant 1.000000e+00 : f32
    %45 = vector.broadcast %cst_22 : f32 to vector<8x128xf32>
    %46 = arith.subf %45, %41 : vector<8x128xf32>
    %47 = arith.mulf %46, %44 : vector<8x128xf32>
    %48 = arith.mulf %41, %17 : vector<8x128xf32>
    %49 = arith.addf %47, %48 : vector<8x128xf32>
    %c0_23 = arith.constant 0 : index
    %c0_24 = arith.constant 0 : index
    %50 = vector.load %arg8[%c0_23, %c0_24] : memref<8x128xf32, #tpu.memory_space<vmem>>, vector<8x128xf32>
    tpu.vector_store %arg8[%c0_23, %c0_24], %49 {strides = array<i32>} : memref<8x128xf32, #tpu.memory_space<vmem>>, vector<8x128xf32>,
    %51 = arith.truncf %49 : vector<8x128xf32> to vector<8x128xbf16>
    %52 = arith.index_cast %c0_i32_14 : i32 to index
    %c0_25 = arith.constant 0 : index
    %c0_26 = arith.constant 0 : index
    %53 = vector.load %arg7[%52, %c0_25, %c0_26] : memref<8x8x128xbf16, #tpu.memory_space<vmem>>, vector<1x8x128xbf16>
    %54 = vector.shape_cast %53 : vector<1x8x128xbf16> to vector<8x128xbf16>
    %55 = vector.shape_cast %51 : vector<8x128xbf16> to vector<1x8x128xbf16>
    tpu.vector_store %arg7[%52, %c0_25, %c0_26], %55 {strides = array<i32>} : memref<8x8x128xbf16, #tpu.memory_space<vmem>>, vector<1x8x128xbf16>,
    %c1_i32 = arith.constant 1 : i32
    %c0_27 = arith.constant 0 : index
    %c0_28 = arith.constant 0 : index
    %56 = vector.load %arg8[%c0_27, %c0_28] : memref<8x128xf32, #tpu.memory_space<vmem>>, vector<8x128xf32>
    %57 = arith.truncf %56 : vector<8x128xf32> to vector<8x128xbf16>
    %cst_29 = arith.constant dense<0.000000e+00> : vector<8x384xf32>
    %58 = tpu.matmul %57, %13, %cst_29 {dimension_numbers = #tpu.dot_dimension_numbers<[1], [0], [0], [1], [0, 0, 1, 1], [], []>} : vector<8x128xbf16>, vector<128x384xbf16>, vector<8x384xf32> -> vector<8x384xf32>
    %59 = arith.addf %58, %16 : vector<8x384xf32>
    %60 = arith.index_cast %c1_i32 : i32 to index
    %c0_30 = arith.constant 0 : index
    %c0_31 = arith.constant 0 : index
    %61 = vector.load %arg9[%60, %c0_30, %c0_31] : memref<8x8x384xf32, #tpu.memory_space<vmem>>, vector<1x8x384xf32>
    %62 = vector.shape_cast %61 : vector<1x8x384xf32> to vector<8x384xf32>
    %63 = vector.extract_strided_slice %62 {offsets = [0, 0], sizes = [8, 128], strides = [1, 1]} : vector<8x384xf32> to vector<8x128xf32>
    %64 = vector.extract_strided_slice %62 {offsets = [0, 128], sizes = [8, 128], strides = [1, 1]} : vector<8x384xf32> to vector<8x128xf32>
    %65 = vector.extract_strided_slice %62 {offsets = [0, 256], sizes = [8, 128], strides = [1, 1]} : vector<8x384xf32> to vector<8x128xf32>
    %66 = vector.extract_strided_slice %59 {offsets = [0, 0], sizes = [8, 128], strides = [1, 1]} : vector<8x384xf32> to vector<8x128xf32>
    %67 = vector.extract_strided_slice %59 {offsets = [0, 128], sizes = [8, 128], strides = [1, 1]} : vector<8x384xf32> to vector<8x128xf32>
    %68 = vector.extract_strided_slice %59 {offsets = [0, 256], sizes = [8, 128], strides = [1, 1]} : vector<8x384xf32> to vector<8x128xf32>
    %69 = arith.addf %63, %66 : vector<8x128xf32>
    %70 = arith.negf %69 : vector<8x128xf32>
    %71 = math.exp %70 : vector<8x128xf32>
    %cst_32 = arith.constant 1.000000e+00 : f32
    %72 = vector.broadcast %cst_32 : f32 to vector<8x128xf32>
    %73 = arith.addf %72, %71 : vector<8x128xf32>
    %74 = arith.divf %72, %73 : vector<8x128xf32>
    %75 = arith.addf %64, %67 : vector<8x128xf32>
    %76 = arith.negf %75 : vector<8x128xf32>
    %77 = math.exp %76 : vector<8x128xf32>
    %cst_33 = arith.constant 1.000000e+00 : f32
    %78 = vector.broadcast %cst_33 : f32 to vector<8x128xf32>
    %79 = arith.addf %78, %77 : vector<8x128xf32>
    %80 = arith.divf %78, %79 : vector<8x128xf32>
    %81 = arith.mulf %74, %68 : vector<8x128xf32>
    %82 = arith.addf %65, %81 : vector<8x128xf32>
    %83 = math.tanh %82 : vector<8x128xf32>
    %cst_34 = arith.constant 1.000000e+00 : f32
    %84 = vector.broadcast %cst_34 : f32 to vector<8x128xf32>
    %85 = arith.subf %84, %80 : vector<8x128xf32>
    %86 = arith.mulf %85, %83 : vector<8x128xf32>
    %87 = arith.mulf %80, %56 : vector<8x128xf32>
    %88 = arith.addf %86, %87 : vector<8x128xf32>
    %c0_35 = arith.constant 0 : index
    %c0_36 = arith.constant 0 : index
    %89 = vector.load %arg8[%c0_35, %c0_36] : memref<8x128xf32, #tpu.memory_space<vmem>>, vector<8x128xf32>
    tpu.vector_store %arg8[%c0_35, %c0_36], %88 {strides = array<i32>} : memref<8x128xf32, #tpu.memory_space<vmem>>, vector<8x128xf32>,
    %90 = arith.truncf %88 : vector<8x128xf32> to vector<8x128xbf16>
    %91 = arith.index_cast %c1_i32 : i32 to index
    %c0_37 = arith.constant 0 : index
    %c0_38 = arith.constant 0 : index
    %92 = vector.load %arg7[%91, %c0_37, %c0_38] : memref<8x8x128xbf16, #tpu.memory_space<vmem>>, vector<1x8x128xbf16>
    %93 = vector.shape_cast %92 : vector<1x8x128xbf16> to vector<8x128xbf16>
    %94 = vector.shape_cast %90 : vector<8x128xbf16> to vector<1x8x128xbf16>
    tpu.vector_store %arg7[%91, %c0_37, %c0_38], %94 {strides = array<i32>} : memref<8x8x128xbf16, #tpu.memory_space<vmem>>, vector<1x8x128xbf16>,
    %c2_i32 = arith.constant 2 : i32
    %c0_39 = arith.constant 0 : index
    %c0_40 = arith.constant 0 : index
    %95 = vector.load %arg8[%c0_39, %c0_40] : memref<8x128xf32, #tpu.memory_space<vmem>>, vector<8x128xf32>
    %96 = arith.truncf %95 : vector<8x128xf32> to vector<8x128xbf16>
    %cst_41 = arith.constant dense<0.000000e+00> : vector<8x384xf32>
    %97 = tpu.matmul %96, %13, %cst_41 {dimension_numbers = #tpu.dot_dimension_numbers<[1], [0], [0], [1], [0, 0, 1, 1], [], []>} : vector<8x128xbf16>, vector<128x384xbf16>, vector<8x384xf32> -> vector<8x384xf32>
    %98 = arith.addf %97, %16 : vector<8x384xf32>
    %99 = arith.index_cast %c2_i32 : i32 to index
    %c0_42 = arith.constant 0 : index
    %c0_43 = arith.constant 0 : index
    %100 = vector.load %arg9[%99, %c0_42, %c0_43] : memref<8x8x384xf32, #tpu.memory_space<vmem>>, vector<1x8x384xf32>
    %101 = vector.shape_cast %100 : vector<1x8x384xf32> to vector<8x384xf32>
    %102 = vector.extract_strided_slice %101 {offsets = [0, 0], sizes = [8, 128], strides = [1, 1]} : vector<8x384xf32> to vector<8x128xf32>
    %103 = vector.extract_strided_slice %101 {offsets = [0, 128], sizes = [8, 128], strides = [1, 1]} : vector<8x384xf32> to vector<8x128xf32>
    %104 = vector.extract_strided_slice %101 {offsets = [0, 256], sizes = [8, 128], strides = [1, 1]} : vector<8x384xf32> to vector<8x128xf32>
    %105 = vector.extract_strided_slice %98 {offsets = [0, 0], sizes = [8, 128], strides = [1, 1]} : vector<8x384xf32> to vector<8x128xf32>
    %106 = vector.extract_strided_slice %98 {offsets = [0, 128], sizes = [8, 128], strides = [1, 1]} : vector<8x384xf32> to vector<8x128xf32>
    %107 = vector.extract_strided_slice %98 {offsets = [0, 256], sizes = [8, 128], strides = [1, 1]} : vector<8x384xf32> to vector<8x128xf32>
    %108 = arith.addf %102, %105 : vector<8x128xf32>
    %109 = arith.negf %108 : vector<8x128xf32>
    %110 = math.exp %109 : vector<8x128xf32>
    %cst_44 = arith.constant 1.000000e+00 : f32
    %111 = vector.broadcast %cst_44 : f32 to vector<8x128xf32>
    %112 = arith.addf %111, %110 : vector<8x128xf32>
    %113 = arith.divf %111, %112 : vector<8x128xf32>
    %114 = arith.addf %103, %106 : vector<8x128xf32>
    %115 = arith.negf %114 : vector<8x128xf32>
    %116 = math.exp %115 : vector<8x128xf32>
    %cst_45 = arith.constant 1.000000e+00 : f32
    %117 = vector.broadcast %cst_45 : f32 to vector<8x128xf32>
    %118 = arith.addf %117, %116 : vector<8x128xf32>
    %119 = arith.divf %117, %118 : vector<8x128xf32>
    %120 = arith.mulf %113, %107 : vector<8x128xf32>
    %121 = arith.addf %104, %120 : vector<8x128xf32>
    %122 = math.tanh %121 : vector<8x128xf32>
    %cst_46 = arith.constant 1.000000e+00 : f32
    %123 = vector.broadcast %cst_46 : f32 to vector<8x128xf32>
    %124 = arith.subf %123, %119 : vector<8x128xf32>
    %125 = arith.mulf %124, %122 : vector<8x128xf32>
    %126 = arith.mulf %119, %95 : vector<8x128xf32>
    %127 = arith.addf %125, %126 : vector<8x128xf32>
    %c0_47 = arith.constant 0 : index
    %c0_48 = arith.constant 0 : index
    %128 = vector.load %arg8[%c0_47, %c0_48] : memref<8x128xf32, #tpu.memory_space<vmem>>, vector<8x128xf32>
    tpu.vector_store %arg8[%c0_47, %c0_48], %127 {strides = array<i32>} : memref<8x128xf32, #tpu.memory_space<vmem>>, vector<8x128xf32>,
    %129 = arith.truncf %127 : vector<8x128xf32> to vector<8x128xbf16>
    %130 = arith.index_cast %c2_i32 : i32 to index
    %c0_49 = arith.constant 0 : index
    %c0_50 = arith.constant 0 : index
    %131 = vector.load %arg7[%130, %c0_49, %c0_50] : memref<8x8x128xbf16, #tpu.memory_space<vmem>>, vector<1x8x128xbf16>
    %132 = vector.shape_cast %131 : vector<1x8x128xbf16> to vector<8x128xbf16>
    %133 = vector.shape_cast %129 : vector<8x128xbf16> to vector<1x8x128xbf16>
    tpu.vector_store %arg7[%130, %c0_49, %c0_50], %133 {strides = array<i32>} : memref<8x8x128xbf16, #tpu.memory_space<vmem>>, vector<1x8x128xbf16>,
    %c3_i32 = arith.constant 3 : i32
    %c0_51 = arith.constant 0 : index
    %c0_52 = arith.constant 0 : index
    %134 = vector.load %arg8[%c0_51, %c0_52] : memref<8x128xf32, #tpu.memory_space<vmem>>, vector<8x128xf32>
    %135 = arith.truncf %134 : vector<8x128xf32> to vector<8x128xbf16>
    %cst_53 = arith.constant dense<0.000000e+00> : vector<8x384xf32>
    %136 = tpu.matmul %135, %13, %cst_53 {dimension_numbers = #tpu.dot_dimension_numbers<[1], [0], [0], [1], [0, 0, 1, 1], [], []>} : vector<8x128xbf16>, vector<128x384xbf16>, vector<8x384xf32> -> vector<8x384xf32>
    %137 = arith.addf %136, %16 : vector<8x384xf32>
    %138 = arith.index_cast %c3_i32 : i32 to index
    %c0_54 = arith.constant 0 : index
    %c0_55 = arith.constant 0 : index
    %139 = vector.load %arg9[%138, %c0_54, %c0_55] : memref<8x8x384xf32, #tpu.memory_space<vmem>>, vector<1x8x384xf32>
    %140 = vector.shape_cast %139 : vector<1x8x384xf32> to vector<8x384xf32>
    %141 = vector.extract_strided_slice %140 {offsets = [0, 0], sizes = [8, 128], strides = [1, 1]} : vector<8x384xf32> to vector<8x128xf32>
    %142 = vector.extract_strided_slice %140 {offsets = [0, 128], sizes = [8, 128], strides = [1, 1]} : vector<8x384xf32> to vector<8x128xf32>
    %143 = vector.extract_strided_slice %140 {offsets = [0, 256], sizes = [8, 128], strides = [1, 1]} : vector<8x384xf32> to vector<8x128xf32>
    %144 = vector.extract_strided_slice %137 {offsets = [0, 0], sizes = [8, 128], strides = [1, 1]} : vector<8x384xf32> to vector<8x128xf32>
    %145 = vector.extract_strided_slice %137 {offsets = [0, 128], sizes = [8, 128], strides = [1, 1]} : vector<8x384xf32> to vector<8x128xf32>
    %146 = vector.extract_strided_slice %137 {offsets = [0, 256], sizes = [8, 128], strides = [1, 1]} : vector<8x384xf32> to vector<8x128xf32>
    %147 = arith.addf %141, %144 : vector<8x128xf32>
    %148 = arith.negf %147 : vector<8x128xf32>
    %149 = math.exp %148 : vector<8x128xf32>
    %cst_56 = arith.constant 1.000000e+00 : f32
    %150 = vector.broadcast %cst_56 : f32 to vector<8x128xf32>
    %151 = arith.addf %150, %149 : vector<8x128xf32>
    %152 = arith.divf %150, %151 : vector<8x128xf32>
    %153 = arith.addf %142, %145 : vector<8x128xf32>
    %154 = arith.negf %153 : vector<8x128xf32>
    %155 = math.exp %154 : vector<8x128xf32>
    %cst_57 = arith.constant 1.000000e+00 : f32
    %156 = vector.broadcast %cst_57 : f32 to vector<8x128xf32>
    %157 = arith.addf %156, %155 : vector<8x128xf32>
    %158 = arith.divf %156, %157 : vector<8x128xf32>
    %159 = arith.mulf %152, %146 : vector<8x128xf32>
    %160 = arith.addf %143, %159 : vector<8x128xf32>
    %161 = math.tanh %160 : vector<8x128xf32>
    %cst_58 = arith.constant 1.000000e+00 : f32
    %162 = vector.broadcast %cst_58 : f32 to vector<8x128xf32>
    %163 = arith.subf %162, %158 : vector<8x128xf32>
    %164 = arith.mulf %163, %161 : vector<8x128xf32>
    %165 = arith.mulf %158, %134 : vector<8x128xf32>
    %166 = arith.addf %164, %165 : vector<8x128xf32>
    %c0_59 = arith.constant 0 : index
    %c0_60 = arith.constant 0 : index
    %167 = vector.load %arg8[%c0_59, %c0_60] : memref<8x128xf32, #tpu.memory_space<vmem>>, vector<8x128xf32>
    tpu.vector_store %arg8[%c0_59, %c0_60], %166 {strides = array<i32>} : memref<8x128xf32, #tpu.memory_space<vmem>>, vector<8x128xf32>,
    %168 = arith.truncf %166 : vector<8x128xf32> to vector<8x128xbf16>
    %169 = arith.index_cast %c3_i32 : i32 to index
    %c0_61 = arith.constant 0 : index
    %c0_62 = arith.constant 0 : index
    %170 = vector.load %arg7[%169, %c0_61, %c0_62] : memref<8x8x128xbf16, #tpu.memory_space<vmem>>, vector<1x8x128xbf16>
    %171 = vector.shape_cast %170 : vector<1x8x128xbf16> to vector<8x128xbf16>
    %172 = vector.shape_cast %168 : vector<8x128xbf16> to vector<1x8x128xbf16>
    tpu.vector_store %arg7[%169, %c0_61, %c0_62], %172 {strides = array<i32>} : memref<8x8x128xbf16, #tpu.memory_space<vmem>>, vector<1x8x128xbf16>,
    %c4_i32 = arith.constant 4 : i32
    %c0_63 = arith.constant 0 : index
    %c0_64 = arith.constant 0 : index
    %173 = vector.load %arg8[%c0_63, %c0_64] : memref<8x128xf32, #tpu.memory_space<vmem>>, vector<8x128xf32>
    %174 = arith.truncf %173 : vector<8x128xf32> to vector<8x128xbf16>
    %cst_65 = arith.constant dense<0.000000e+00> : vector<8x384xf32>
    %175 = tpu.matmul %174, %13, %cst_65 {dimension_numbers = #tpu.dot_dimension_numbers<[1], [0], [0], [1], [0, 0, 1, 1], [], []>} : vector<8x128xbf16>, vector<128x384xbf16>, vector<8x384xf32> -> vector<8x384xf32>
    %176 = arith.addf %175, %16 : vector<8x384xf32>
    %177 = arith.index_cast %c4_i32 : i32 to index
    %c0_66 = arith.constant 0 : index
    %c0_67 = arith.constant 0 : index
    %178 = vector.load %arg9[%177, %c0_66, %c0_67] : memref<8x8x384xf32, #tpu.memory_space<vmem>>, vector<1x8x384xf32>
    %179 = vector.shape_cast %178 : vector<1x8x384xf32> to vector<8x384xf32>
    %180 = vector.extract_strided_slice %179 {offsets = [0, 0], sizes = [8, 128], strides = [1, 1]} : vector<8x384xf32> to vector<8x128xf32>
    %181 = vector.extract_strided_slice %179 {offsets = [0, 128], sizes = [8, 128], strides = [1, 1]} : vector<8x384xf32> to vector<8x128xf32>
    %182 = vector.extract_strided_slice %179 {offsets = [0, 256], sizes = [8, 128], strides = [1, 1]} : vector<8x384xf32> to vector<8x128xf32>
    %183 = vector.extract_strided_slice %176 {offsets = [0, 0], sizes = [8, 128], strides = [1, 1]} : vector<8x384xf32> to vector<8x128xf32>
    %184 = vector.extract_strided_slice %176 {offsets = [0, 128], sizes = [8, 128], strides = [1, 1]} : vector<8x384xf32> to vector<8x128xf32>
    %185 = vector.extract_strided_slice %176 {offsets = [0, 256], sizes = [8, 128], strides = [1, 1]} : vector<8x384xf32> to vector<8x128xf32>
    %186 = arith.addf %180, %183 : vector<8x128xf32>
    %187 = arith.negf %186 : vector<8x128xf32>
    %188 = math.exp %187 : vector<8x128xf32>
    %cst_68 = arith.constant 1.000000e+00 : f32
    %189 = vector.broadcast %cst_68 : f32 to vector<8x128xf32>
    %190 = arith.addf %189, %188 : vector<8x128xf32>
    %191 = arith.divf %189, %190 : vector<8x128xf32>
    %192 = arith.addf %181, %184 : vector<8x128xf32>
    %193 = arith.negf %192 : vector<8x128xf32>
    %194 = math.exp %193 : vector<8x128xf32>
    %cst_69 = arith.constant 1.000000e+00 : f32
    %195 = vector.broadcast %cst_69 : f32 to vector<8x128xf32>
    %196 = arith.addf %195, %194 : vector<8x128xf32>
    %197 = arith.divf %195, %196 : vector<8x128xf32>
    %198 = arith.mulf %191, %185 : vector<8x128xf32>
    %199 = arith.addf %182, %198 : vector<8x128xf32>
    %200 = math.tanh %199 : vector<8x128xf32>
    %cst_70 = arith.constant 1.000000e+00 : f32
    %201 = vector.broadcast %cst_70 : f32 to vector<8x128xf32>
    %202 = arith.subf %201, %197 : vector<8x128xf32>
    %203 = arith.mulf %202, %200 : vector<8x128xf32>
    %204 = arith.mulf %197, %173 : vector<8x128xf32>
    %205 = arith.addf %203, %204 : vector<8x128xf32>
    %c0_71 = arith.constant 0 : index
    %c0_72 = arith.constant 0 : index
    %206 = vector.load %arg8[%c0_71, %c0_72] : memref<8x128xf32, #tpu.memory_space<vmem>>, vector<8x128xf32>
    tpu.vector_store %arg8[%c0_71, %c0_72], %205 {strides = array<i32>} : memref<8x128xf32, #tpu.memory_space<vmem>>, vector<8x128xf32>,
    %207 = arith.truncf %205 : vector<8x128xf32> to vector<8x128xbf16>
    %208 = arith.index_cast %c4_i32 : i32 to index
    %c0_73 = arith.constant 0 : index
    %c0_74 = arith.constant 0 : index
    %209 = vector.load %arg7[%208, %c0_73, %c0_74] : memref<8x8x128xbf16, #tpu.memory_space<vmem>>, vector<1x8x128xbf16>
    %210 = vector.shape_cast %209 : vector<1x8x128xbf16> to vector<8x128xbf16>
    %211 = vector.shape_cast %207 : vector<8x128xbf16> to vector<1x8x128xbf16>
    tpu.vector_store %arg7[%208, %c0_73, %c0_74], %211 {strides = array<i32>} : memref<8x8x128xbf16, #tpu.memory_space<vmem>>, vector<1x8x128xbf16>,
    %c5_i32 = arith.constant 5 : i32
    %c0_75 = arith.constant 0 : index
    %c0_76 = arith.constant 0 : index
    %212 = vector.load %arg8[%c0_75, %c0_76] : memref<8x128xf32, #tpu.memory_space<vmem>>, vector<8x128xf32>
    %213 = arith.truncf %212 : vector<8x128xf32> to vector<8x128xbf16>
    %cst_77 = arith.constant dense<0.000000e+00> : vector<8x384xf32>
    %214 = tpu.matmul %213, %13, %cst_77 {dimension_numbers = #tpu.dot_dimension_numbers<[1], [0], [0], [1], [0, 0, 1, 1], [], []>} : vector<8x128xbf16>, vector<128x384xbf16>, vector<8x384xf32> -> vector<8x384xf32>
    %215 = arith.addf %214, %16 : vector<8x384xf32>
    %216 = arith.index_cast %c5_i32 : i32 to index
    %c0_78 = arith.constant 0 : index
    %c0_79 = arith.constant 0 : index
    %217 = vector.load %arg9[%216, %c0_78, %c0_79] : memref<8x8x384xf32, #tpu.memory_space<vmem>>, vector<1x8x384xf32>
    %218 = vector.shape_cast %217 : vector<1x8x384xf32> to vector<8x384xf32>
    %219 = vector.extract_strided_slice %218 {offsets = [0, 0], sizes = [8, 128], strides = [1, 1]} : vector<8x384xf32> to vector<8x128xf32>
    %220 = vector.extract_strided_slice %218 {offsets = [0, 128], sizes = [8, 128], strides = [1, 1]} : vector<8x384xf32> to vector<8x128xf32>
    %221 = vector.extract_strided_slice %218 {offsets = [0, 256], sizes = [8, 128], strides = [1, 1]} : vector<8x384xf32> to vector<8x128xf32>
    %222 = vector.extract_strided_slice %215 {offsets = [0, 0], sizes = [8, 128], strides = [1, 1]} : vector<8x384xf32> to vector<8x128xf32>
    %223 = vector.extract_strided_slice %215 {offsets = [0, 128], sizes = [8, 128], strides = [1, 1]} : vector<8x384xf32> to vector<8x128xf32>
    %224 = vector.extract_strided_slice %215 {offsets = [0, 256], sizes = [8, 128], strides = [1, 1]} : vector<8x384xf32> to vector<8x128xf32>
    %225 = arith.addf %219, %222 : vector<8x128xf32>
    %226 = arith.negf %225 : vector<8x128xf32>
    %227 = math.exp %226 : vector<8x128xf32>
    %cst_80 = arith.constant 1.000000e+00 : f32
    %228 = vector.broadcast %cst_80 : f32 to vector<8x128xf32>
    %229 = arith.addf %228, %227 : vector<8x128xf32>
    %230 = arith.divf %228, %229 : vector<8x128xf32>
    %231 = arith.addf %220, %223 : vector<8x128xf32>
    %232 = arith.negf %231 : vector<8x128xf32>
    %233 = math.exp %232 : vector<8x128xf32>
    %cst_81 = arith.constant 1.000000e+00 : f32
    %234 = vector.broadcast %cst_81 : f32 to vector<8x128xf32>
    %235 = arith.addf %234, %233 : vector<8x128xf32>
    %236 = arith.divf %234, %235 : vector<8x128xf32>
    %237 = arith.mulf %230, %224 : vector<8x128xf32>
    %238 = arith.addf %221, %237 : vector<8x128xf32>
    %239 = math.tanh %238 : vector<8x128xf32>
    %cst_82 = arith.constant 1.000000e+00 : f32
    %240 = vector.broadcast %cst_82 : f32 to vector<8x128xf32>
    %241 = arith.subf %240, %236 : vector<8x128xf32>
    %242 = arith.mulf %241, %239 : vector<8x128xf32>
    %243 = arith.mulf %236, %212 : vector<8x128xf32>
    %244 = arith.addf %242, %243 : vector<8x128xf32>
    %c0_83 = arith.constant 0 : index
    %c0_84 = arith.constant 0 : index
    %245 = vector.load %arg8[%c0_83, %c0_84] : memref<8x128xf32, #tpu.memory_space<vmem>>, vector<8x128xf32>
    tpu.vector_store %arg8[%c0_83, %c0_84], %244 {strides = array<i32>} : memref<8x128xf32, #tpu.memory_space<vmem>>, vector<8x128xf32>,
    %246 = arith.truncf %244 : vector<8x128xf32> to vector<8x128xbf16>
    %247 = arith.index_cast %c5_i32 : i32 to index
    %c0_85 = arith.constant 0 : index
    %c0_86 = arith.constant 0 : index
    %248 = vector.load %arg7[%247, %c0_85, %c0_86] : memref<8x8x128xbf16, #tpu.memory_space<vmem>>, vector<1x8x128xbf16>
    %249 = vector.shape_cast %248 : vector<1x8x128xbf16> to vector<8x128xbf16>
    %250 = vector.shape_cast %246 : vector<8x128xbf16> to vector<1x8x128xbf16>
    tpu.vector_store %arg7[%247, %c0_85, %c0_86], %250 {strides = array<i32>} : memref<8x8x128xbf16, #tpu.memory_space<vmem>>, vector<1x8x128xbf16>,
    %c6_i32 = arith.constant 6 : i32
    %c0_87 = arith.constant 0 : index
    %c0_88 = arith.constant 0 : index
    %251 = vector.load %arg8[%c0_87, %c0_88] : memref<8x128xf32, #tpu.memory_space<vmem>>, vector<8x128xf32>
    %252 = arith.truncf %251 : vector<8x128xf32> to vector<8x128xbf16>
    %cst_89 = arith.constant dense<0.000000e+00> : vector<8x384xf32>
    %253 = tpu.matmul %252, %13, %cst_89 {dimension_numbers = #tpu.dot_dimension_numbers<[1], [0], [0], [1], [0, 0, 1, 1], [], []>} : vector<8x128xbf16>, vector<128x384xbf16>, vector<8x384xf32> -> vector<8x384xf32>
    %254 = arith.addf %253, %16 : vector<8x384xf32>
    %255 = arith.index_cast %c6_i32 : i32 to index
    %c0_90 = arith.constant 0 : index
    %c0_91 = arith.constant 0 : index
    %256 = vector.load %arg9[%255, %c0_90, %c0_91] : memref<8x8x384xf32, #tpu.memory_space<vmem>>, vector<1x8x384xf32>
    %257 = vector.shape_cast %256 : vector<1x8x384xf32> to vector<8x384xf32>
    %258 = vector.extract_strided_slice %257 {offsets = [0, 0], sizes = [8, 128], strides = [1, 1]} : vector<8x384xf32> to vector<8x128xf32>
    %259 = vector.extract_strided_slice %257 {offsets = [0, 128], sizes = [8, 128], strides = [1, 1]} : vector<8x384xf32> to vector<8x128xf32>
    %260 = vector.extract_strided_slice %257 {offsets = [0, 256], sizes = [8, 128], strides = [1, 1]} : vector<8x384xf32> to vector<8x128xf32>
    %261 = vector.extract_strided_slice %254 {offsets = [0, 0], sizes = [8, 128], strides = [1, 1]} : vector<8x384xf32> to vector<8x128xf32>
    %262 = vector.extract_strided_slice %254 {offsets = [0, 128], sizes = [8, 128], strides = [1, 1]} : vector<8x384xf32> to vector<8x128xf32>
    %263 = vector.extract_strided_slice %254 {offsets = [0, 256], sizes = [8, 128], strides = [1, 1]} : vector<8x384xf32> to vector<8x128xf32>
    %264 = arith.addf %258, %261 : vector<8x128xf32>
    %265 = arith.negf %264 : vector<8x128xf32>
    %266 = math.exp %265 : vector<8x128xf32>
    %cst_92 = arith.constant 1.000000e+00 : f32
    %267 = vector.broadcast %cst_92 : f32 to vector<8x128xf32>
    %268 = arith.addf %267, %266 : vector<8x128xf32>
    %269 = arith.divf %267, %268 : vector<8x128xf32>
    %270 = arith.addf %259, %262 : vector<8x128xf32>
    %271 = arith.negf %270 : vector<8x128xf32>
    %272 = math.exp %271 : vector<8x128xf32>
    %cst_93 = arith.constant 1.000000e+00 : f32
    %273 = vector.broadcast %cst_93 : f32 to vector<8x128xf32>
    %274 = arith.addf %273, %272 : vector<8x128xf32>
    %275 = arith.divf %273, %274 : vector<8x128xf32>
    %276 = arith.mulf %269, %263 : vector<8x128xf32>
    %277 = arith.addf %260, %276 : vector<8x128xf32>
    %278 = math.tanh %277 : vector<8x128xf32>
    %cst_94 = arith.constant 1.000000e+00 : f32
    %279 = vector.broadcast %cst_94 : f32 to vector<8x128xf32>
    %280 = arith.subf %279, %275 : vector<8x128xf32>
    %281 = arith.mulf %280, %278 : vector<8x128xf32>
    %282 = arith.mulf %275, %251 : vector<8x128xf32>
    %283 = arith.addf %281, %282 : vector<8x128xf32>
    %c0_95 = arith.constant 0 : index
    %c0_96 = arith.constant 0 : index
    %284 = vector.load %arg8[%c0_95, %c0_96] : memref<8x128xf32, #tpu.memory_space<vmem>>, vector<8x128xf32>
    tpu.vector_store %arg8[%c0_95, %c0_96], %283 {strides = array<i32>} : memref<8x128xf32, #tpu.memory_space<vmem>>, vector<8x128xf32>,
    %285 = arith.truncf %283 : vector<8x128xf32> to vector<8x128xbf16>
    %286 = arith.index_cast %c6_i32 : i32 to index
    %c0_97 = arith.constant 0 : index
    %c0_98 = arith.constant 0 : index
    %287 = vector.load %arg7[%286, %c0_97, %c0_98] : memref<8x8x128xbf16, #tpu.memory_space<vmem>>, vector<1x8x128xbf16>
    %288 = vector.shape_cast %287 : vector<1x8x128xbf16> to vector<8x128xbf16>
    %289 = vector.shape_cast %285 : vector<8x128xbf16> to vector<1x8x128xbf16>
    tpu.vector_store %arg7[%286, %c0_97, %c0_98], %289 {strides = array<i32>} : memref<8x8x128xbf16, #tpu.memory_space<vmem>>, vector<1x8x128xbf16>,
    %c7_i32 = arith.constant 7 : i32
    %c0_99 = arith.constant 0 : index
    %c0_100 = arith.constant 0 : index
    %290 = vector.load %arg8[%c0_99, %c0_100] : memref<8x128xf32, #tpu.memory_space<vmem>>, vector<8x128xf32>
    %291 = arith.truncf %290 : vector<8x128xf32> to vector<8x128xbf16>
    %cst_101 = arith.constant dense<0.000000e+00> : vector<8x384xf32>
    %292 = tpu.matmul %291, %13, %cst_101 {dimension_numbers = #tpu.dot_dimension_numbers<[1], [0], [0], [1], [0, 0, 1, 1], [], []>} : vector<8x128xbf16>, vector<128x384xbf16>, vector<8x384xf32> -> vector<8x384xf32>
    %293 = arith.addf %292, %16 : vector<8x384xf32>
    %294 = arith.index_cast %c7_i32 : i32 to index
    %c0_102 = arith.constant 0 : index
    %c0_103 = arith.constant 0 : index
    %295 = vector.load %arg9[%294, %c0_102, %c0_103] : memref<8x8x384xf32, #tpu.memory_space<vmem>>, vector<1x8x384xf32>
    %296 = vector.shape_cast %295 : vector<1x8x384xf32> to vector<8x384xf32>
    %297 = vector.extract_strided_slice %296 {offsets = [0, 0], sizes = [8, 128], strides = [1, 1]} : vector<8x384xf32> to vector<8x128xf32>
    %298 = vector.extract_strided_slice %296 {offsets = [0, 128], sizes = [8, 128], strides = [1, 1]} : vector<8x384xf32> to vector<8x128xf32>
    %299 = vector.extract_strided_slice %296 {offsets = [0, 256], sizes = [8, 128], strides = [1, 1]} : vector<8x384xf32> to vector<8x128xf32>
    %300 = vector.extract_strided_slice %293 {offsets = [0, 0], sizes = [8, 128], strides = [1, 1]} : vector<8x384xf32> to vector<8x128xf32>
    %301 = vector.extract_strided_slice %293 {offsets = [0, 128], sizes = [8, 128], strides = [1, 1]} : vector<8x384xf32> to vector<8x128xf32>
    %302 = vector.extract_strided_slice %293 {offsets = [0, 256], sizes = [8, 128], strides = [1, 1]} : vector<8x384xf32> to vector<8x128xf32>
    %303 = arith.addf %297, %300 : vector<8x128xf32>
    %304 = arith.negf %303 : vector<8x128xf32>
    %305 = math.exp %304 : vector<8x128xf32>
    %cst_104 = arith.constant 1.000000e+00 : f32
    %306 = vector.broadcast %cst_104 : f32 to vector<8x128xf32>
    %307 = arith.addf %306, %305 : vector<8x128xf32>
    %308 = arith.divf %306, %307 : vector<8x128xf32>
    %309 = arith.addf %298, %301 : vector<8x128xf32>
    %310 = arith.negf %309 : vector<8x128xf32>
    %311 = math.exp %310 : vector<8x128xf32>
    %cst_105 = arith.constant 1.000000e+00 : f32
    %312 = vector.broadcast %cst_105 : f32 to vector<8x128xf32>
    %313 = arith.addf %312, %311 : vector<8x128xf32>
    %314 = arith.divf %312, %313 : vector<8x128xf32>
    %315 = arith.mulf %308, %302 : vector<8x128xf32>
    %316 = arith.addf %299, %315 : vector<8x128xf32>
    %317 = math.tanh %316 : vector<8x128xf32>
    %cst_106 = arith.constant 1.000000e+00 : f32
    %318 = vector.broadcast %cst_106 : f32 to vector<8x128xf32>
    %319 = arith.subf %318, %314 : vector<8x128xf32>
    %320 = arith.mulf %319, %317 : vector<8x128xf32>
    %321 = arith.mulf %314, %290 : vector<8x128xf32>
    %322 = arith.addf %320, %321 : vector<8x128xf32>
    %c0_107 = arith.constant 0 : index
    %c0_108 = arith.constant 0 : index
    %323 = vector.load %arg8[%c0_107, %c0_108] : memref<8x128xf32, #tpu.memory_space<vmem>>, vector<8x128xf32>
    tpu.vector_store %arg8[%c0_107, %c0_108], %322 {strides = array<i32>} : memref<8x128xf32, #tpu.memory_space<vmem>>, vector<8x128xf32>,
    %324 = arith.truncf %322 : vector<8x128xf32> to vector<8x128xbf16>
    %325 = arith.index_cast %c7_i32 : i32 to index
    %c0_109 = arith.constant 0 : index
    %c0_110 = arith.constant 0 : index
    %326 = vector.load %arg7[%325, %c0_109, %c0_110] : memref<8x8x128xbf16, #tpu.memory_space<vmem>>, vector<1x8x128xbf16>
    %327 = vector.shape_cast %326 : vector<1x8x128xbf16> to vector<8x128xbf16>
    %328 = vector.shape_cast %324 : vector<8x128xbf16> to vector<1x8x128xbf16>
    tpu.vector_store %arg7[%325, %c0_109, %c0_110], %328 {strides = array<i32>} : memref<8x8x128xbf16, #tpu.memory_space<vmem>>, vector<1x8x128xbf16>,
    %c8_i32 = arith.constant 8 : i32
    return
  }
  func.func @transform_0(%arg0: i32, %arg1: i32) -> (i32, i32, i32) {
    %c0_i32 = arith.constant 0 : i32
    %c0_i32_0 = arith.constant 0 : i32
    return %arg1, %arg0, %c0_i32 : i32, i32, i32
  }
  func.func @transform_1(%arg0: i32, %arg1: i32) -> (i32, i32) {
    %c0_i32 = arith.constant 0 : i32
    %c0_i32_0 = arith.constant 0 : i32
    %c0_i32_1 = arith.constant 0 : i32
    return %c0_i32, %c0_i32_0 : i32, i32
  }
  func.func @transform_2(%arg0: i32, %arg1: i32) -> (i32, i32) {
    %c0_i32 = arith.constant 0 : i32
    %c0_i32_0 = arith.constant 0 : i32
    %c0_i32_1 = arith.constant 0 : i32
    return %c0_i32, %c0_i32_0 : i32, i32
  }
  func.func @transform_3(%arg0: i32, %arg1: i32) -> (i32, i32) {
    %c0_i32 = arith.constant 0 : i32
    %c0_i32_0 = arith.constant 0 : i32
    %c0_i32_1 = arith.constant 0 : i32
    return %c0_i32, %c0_i32_0 : i32, i32
  }
  func.func @transform_4(%arg0: i32, %arg1: i32) -> (i32, i32) {
    %c0_i32 = arith.constant 0 : i32
    %c0_i32_0 = arith.constant 0 : i32
    %c0_i32_1 = arith.constant 0 : i32
    return %c0_i32, %c0_i32_0 : i32, i32
  }
  func.func @transform_5(%arg0: i32, %arg1: i32) -> (i32, i32, i32) {
    %c0_i32 = arith.constant 0 : i32
    %c0_i32_0 = arith.constant 0 : i32
    return %arg1, %arg0, %c0_i32 : i32, i32, i32
  }
}

</mosaic_0001>

<bundles_post_ra>
// kernel: tpu_custom_call.1
= control target key start
LH: loop header
LB: loop body
LE: loop exit
PB: predicated region body
PF: predicated region fallthrough
CT: control target
= control target key end

     0   :  { %10 = vsyncpa [#allocation5], 0  ;;  %s2417_s0 = inlined_call_operand.vmem [shape: f32[8,8,4], index: 0, kind: input, shape index: {}]   ;;  %s2418_s1 = inlined_call_operand.vmem [shape: bf16[4,384], index: 1, kind: input, shape index: {}]   ;;  %s2419_s2 = inlined_call_operand.hbm [shape: bf16[128,384], index: 2, kind: input, shape index: {}]   ;;  %s2420_s3 = inlined_call_operand.vmem [shape: f32[1,384], index: 3, kind: input, shape index: {}]   ;;  %s2421_s4 = inlined_call_operand.vmem [shape: f32[1,384], index: 4, kind: input, shape index: {}]   ;;  %s2422_s5 = inlined_call_operand.hbm [shape: bf16[8,8,128], index: 5, kind: output, shape index: {}]  }
   0x1   :  { %11 = vsyncpa [#allocation6], 0  ;;  %s1854_s18 = smov [#allocation4]   ;;  %s1806_s22 = scalar_lea.hbm %s2419_s2, 3072 }
   0x2   :  { %s21_s19 = sshll.u32 %s1854_s18, 4  ;;  %p1807_p0 = scmp.ne.s32.totalorder %s2419_s2, %s1806_s22  ;;  %s22_s19 = int_to_ptr.vmem [resolvable:$true] %s21_s19 }
   0x3   :  { %p1810_p1 = scmp.lt.u32.totalorder %s1806_s22, %s2419_s2 }
   0x5   :  { %p1812_p2 = pnand %p1810_p1, %p1807_p0 }
   0x7   :  { %1815 = shalt.err (!%p1812_p2)
}
   0x8   :  { %s1816_s27 = scalar_lea.vmem %s22_s19, 3072  ;;  %p1821_p4 = scmp.lt.s32.totalorder %s22_s19, %s22_s19 }
   0x9   :  { %p1817_p3 = scmp.ne.s32.totalorder %s22_s19, %s1816_s27  ;;  %p1822_p5 = scmp.lt.s32.totalorder %s1816_s27, %s1816_s27 }
   0xb   :  { %p1823_p6 = por %p1822_p5, %p1821_p4 }
   0xd   :  { %p1824_p7 = pnand %p1823_p6, %p1817_p3 }
   0xf   :  { %1827 = shalt.err (!%p1824_p7)
}
  0x10   :  { %s1855_s28 = smov 192   ;;  %s1856_s29 = smov 12  }
  0x11   :  { %27 = dma.hbm_to_vmem [thread:$0]  %s2419_s2, 3072, %s22_s19, [#allocation5], %s1855_s28, %s1855_s28, %s1856_s29  }
  0x12   :  { %1850 = dma.done.wait [#allocation5], 3072  }
  0x13   :  { %1851 = vsyncadd [#allocation5], 4294964224  ;;  %v56_v0 = vlaneseq  ;;  %v1857_v1 = vmov 1983009808   ;;  %v2423_v3 = vmov 0   ;;  %vm101_vm0 = vcmask 1041408  }
  0x14   :  { %v74_v2 = vunpack.c.l.s4 %v1857_v1  ;;  %143 = vmatprep.mubr.bf16.mxu0 %v2423_v3  ;;  %v53_v7 = vld [vmem:[%s2418_s1] sm:$0x3f]  ;;  %v42_v10 = vld [vmem:[%s2417_s0 + $0x8] sm:$0xff]  ;;  %vm88_vm1 = vcmask 31744   ;;  %v43_v17 = vld [vmem:[%s2417_s0 + $0x10] sm:$0xff]  ;;  %v2425_v25 = vmov 0.0  }
  0x15   :  { %v1908_v4 = vshrl.u32 %v56_v0, 7  ;;  %v41_v9 = vld [vmem:[%s2417_s0] sm:$0xff]  ;;  %v72_v15 = vcombine.high %v53_v7, %v53_v7  ;;  %v44_v19 = vld [vmem:[%s2417_s0 + $0x18] sm:$0xff]  ;;  %v46_v23 = vld [vmem:[%s2417_s0 + $0x28] sm:$0xff]  ;;  %vm1860_vm2 = vmmov 0   ;;  %v1861_v51 = vmov 0.0|0.0  }
  0x16   :  { %v75_v5 = vunpack.c.0.s8 %v74_v2  ;;  %v49_v11 = vpack.c.bf16 %v42_v10, %v41_v9  ;;  %v1921_v14 = vld [vmem:[#allocation4 + $0x4] ss:$12 sps:$4 sm:$0xff]   ;;  %v1923_v16 = vld [vmem:[#allocation4] ss:$12 sps:$4 sm:$0xff]   ;;  %v1934_v20 = vld [vmem:[#allocation4 + $0x1c] ss:$12 sps:$4 sm:$0xff]   ;;  %v50_v24 = vpack.c.bf16 %v44_v19, %v43_v17 }
  0x17   :  { %v45_v21 = vld [vmem:[%s2417_s0 + $0x20] sm:$0xff]  ;;  %v1954_v29 = vld [vmem:[#allocation4 + $0x30] ss:$12 sps:$4 sm:$0xff]   ;;  %v1957_v30 = vld [vmem:[#allocation4 + $0x4c] ss:$12 sps:$4 sm:$0xff]   ;;  %v58_v52 = vsub.s32 0, %v1908_v4 }
  0x18   :  { %v78_v6 = vsub.s32 %v75_v5, %v1908_v4  ;;  %1489 = vmatprep.mubr.msk.bf16.mxu1 %vm88_vm1, %v49_v11  ;;  %v1947_v26 = vld [vmem:[#allocation4 + $0x18] ss:$12 sps:$4 sm:$0xff]   ;;  %v51_v27 = vpack.c.bf16 %v46_v23, %v45_v21  ;;  %v1951_v28 = vld [vmem:[#allocation4 + $0x34] ss:$12 sps:$4 sm:$0xff]   ;;  %v1992_v40 = vld [vmem:[#allocation4 + $0x7c] ss:$12 sps:$4 sm:$0xff]  }
  0x19   :  { %v1959_v31 = vld [vmem:[#allocation4 + $0x8] ss:$12 sps:$4 sm:$0xff]   ;;  %v48_v33 = vld [vmem:[%s2417_s0 + $0x38] sm:$0xff]  ;;  %v1971_v34 = vld [vmem:[#allocation4 + $0x20] ss:$12 sps:$4 sm:$0xff]   ;;  %v62_v54 = vsub.s32 1, %v1908_v4 }
  0x1a   :  { %v79_v8 = vrot.slane %v53_v7, %v78_v6  ;;  %v86_v18 = vrot.slane %v72_v15, %v78_v6  ;;  %v47_v32 = vld [vmem:[%s2417_s0 + $0x30] sm:$0xff]  ;;  %v1982_v38 = vld [vmem:[#allocation4 + $0x38] ss:$12 sps:$4 sm:$0xff]   ;;  %v1989_v39 = vld [vmem:[#allocation4 + $0x60] ss:$12 sps:$4 sm:$0xff]   ;;  %v2427_v55 = vsub.s32 2, %v1908_v4 }
  0x1b   :  { %v1974_v35 = vld [vmem:[#allocation4 + $0x48] ss:$12 sps:$4 sm:$0xff]   ;;  %v1978_v36 = vld [vmem:[#allocation4 + $0x64] ss:$12 sps:$4 sm:$0xff]   ;;  %v52_v37 = vpack.c.bf16 %v48_v33, %v47_v32  ;;  %v2014_v46 = vld [vmem:[#allocation4 + $0xac] ss:$12 sps:$4 sm:$0xff]  }
  0x1c   :  { %v87_v12 = vcombine.high %v79_v8, %v79_v8  ;;  %v103_v13 = vsel %vm101_vm0, %v79_v8, 0  ;;  %1657 = vmatprep.subr.msk.bf16.mxu1 %vm101_vm0, %v86_v18  ;;  %v109_v22 = vsel %vm101_vm0, %v86_v18, 0  ;;  %v1995_v41 = vld [vmem:[#allocation4 + $0x50] ss:$12 sps:$4 sm:$0xff]   ;;  %v2000_v42 = vld [vmem:[#allocation4 + $0x78] ss:$12 sps:$4 sm:$0xff]  }
  0x1d   :  { %1488 = vmatpush3.bf16.msra.mxu1 %v109_v22  ;;  %v2004_v43 = vld [vmem:[#allocation4 + $0x94] ss:$12 sps:$4 sm:$0xff]   ;;  %v2011_v45 = vld [vmem:[#allocation4 + $0x90] ss:$12 sps:$4 sm:$0xff]   ;;  %v2027_v49 = vld [vmem:[#allocation4 + $0x98] ss:$12 sps:$4 sm:$0xff]  }
  0x1e   :  { %1361 = vmatprep.subr.msk.bf16.mxu0 %vm101_vm0, %v87_v12  ;;  %1497 = vmatprep.subr.bf16.mxu1 %v2425_v25  ;;  %v2007_v44 = vld [vmem:[#allocation4 + $0x68] ss:$12 sps:$4 sm:$0xff]   ;;  %v2017_v47 = vld [vmem:[#allocation4 + $0x80] ss:$12 sps:$4 sm:$0xff]   ;;  %v2032_v50 = vld [vmem:[#allocation4 + $0xb0] ss:$12 sps:$4 sm:$0xff]  }
  0x1f   :  { %112 = vmatpush1.bf16.msra.mxu0 %v103_v13  ;;  %v2022_v48 = vld [vmem:[#allocation4 + $0xa8] ss:$12 sps:$4 sm:$0xff]   ;;  %v54_v53 = vld [vmem:[%s2420_s3] sm:$0x7] }
  0x20   :  { %452 = vmatprep.subr.bf16.mxu0 %v1921_v14  ;;  %1490 = vmatmul.mubr.msk.bf16.vlgmr.msra.gmra.mrb[0].mxu1 %vm88_vm1, %v50_v24  ;;  %v59_v56 = vrot.slane %v54_v53, %v58_v52  ;;  %v63_v57 = vrot.slane %v54_v53, %v62_v54  ;;  %v67_v58 = vrot.slane %v54_v53, %v2427_v55 }
  0x21   :  { %1493 = vmatprep.mubr.msk.bf16.mxu1 %vm88_vm1, %v51_v27  ;;  %1498 = vmatpush3.bf16.msra.mxu1 %v1959_v31 }
  0x22   :  { %1362 = vmatmul.mubr.msk.bf16.vlgmr.msra.gmra.mrb[0].mxu0 %vm88_vm1, %v49_v11  ;;  %1499 = vmatprep.subr.bf16.mxu1 %v2425_v25 }
  0x23   :  { %453 = vmatpush1.bf16.msra.mxu0 %v1923_v16  ;;  %153 = vmatprep.mubr.bf16.mxu0 %v2423_v3 }
  0x24   :  { %454 = vmatprep.subr.bf16.mxu0 %v1934_v20 }
  0x25   :  { %1500 = vmatpush3.bf16.msra.mxu1 %v1971_v34 }
  0x26   :  { %1501 = vmatprep.subr.bf16.mxu1 %v2425_v25 }
  0x27   :  { %455 = vmatpush1.bf16.msra.mxu0 %v1947_v26 }
  0x28   :  { %456 = vmatprep.subr.bf16.mxu0 %v1951_v28  ;;  %1494 = vmatmul.mubr.msk.bf16.gmra.mrb[4].mxu1 %vm88_vm1, %v52_v37 }
  0x29   :  { %1513 = vmatprep.mubr.msk.bf16.mxu1 %vm1860_vm2, %v2425_v25  ;;  %1502 = vmatpush3.bf16.msra.mxu1 %v1982_v38 }
  0x2a   :  { %1363 = vmatmul.mubr.msk.bf16.gmra.mrb[4].mxu0 %vm88_vm1, %v50_v24  ;;  %1503 = vmatprep.subr.bf16.mxu1 %v2425_v25 }
  0x2b   :  { %457 = vmatpush1.bf16.msra.mxu0 %v1954_v29  ;;  %163 = vmatprep.mubr.bf16.mxu0 %v2423_v3 }
  0x2c   :  { %458 = vmatprep.subr.bf16.mxu0 %v1957_v30 }
  0x2d   :  { %1504 = vmatpush3.bf16.msra.mxu1 %v1995_v41 }
  0x2e   :  { %1505 = vmatprep.subr.bf16.mxu1 %v2425_v25 }
  0x2f   :  { %459 = vmatpush1.bf16.msra.mxu0 %v1974_v35 }
  0x30   :  { %460 = vmatprep.subr.bf16.mxu0 %v1978_v36 }
  0x31   :  { %1506 = vmatpush3.bf16.msra.mxu1 %v2007_v44 }
  0x32   :  { %1364 = vmatmul.mubr.msk.bf16.gmra.mrb[8].mxu0 %vm88_vm1, %v51_v27  ;;  %1507 = vmatprep.subr.bf16.mxu1 %v2425_v25 }
  0x33   :  { %461 = vmatpush1.bf16.msra.mxu0 %v1989_v39  ;;  %173 = vmatprep.mubr.bf16.mxu0 %v2423_v3 }
  0x34   :  { %462 = vmatprep.subr.bf16.mxu0 %v1992_v40 }
  0x35   :  { %1508 = vmatpush3.bf16.msra.mxu1 %v2017_v47 }
  0x36   :  { %1509 = vmatprep.subr.bf16.mxu1 %v2425_v25 }
  0x37   :  { %463 = vmatpush1.bf16.msra.mxu0 %v2000_v42 }
  0x38   :  { %464 = vmatprep.subr.bf16.mxu0 %v2004_v43 }
  0x39   :  { %1510 = vmatpush3.bf16.msra.mxu1 %v2027_v49 }
  0x3a   :  { %1365 = vmatmul.mubr.msk.bf16.gmra.mrb[12].mxu0 %vm88_vm1, %v52_v37  ;;  %1511 = vmatprep.subr.bf16.mxu1 %v2425_v25 }
  0x3b   :  { %465 = vmatpush1.bf16.msra.mxu0 %v2011_v45  ;;  %484 = vmatprep.mubr.bf16.mxu0 %v2423_v3 }
  0x3c   :  { %466 = vmatprep.subr.bf16.mxu0 %v2014_v46 }
  0x3d   :  { %1512 = vmatpush3.bf16.msra.mxu1 %v2032_v50 }
  0x3e   :  { %1517 = vmatprep.subr.bf16.mxu1 %v2425_v25 }
  0x3f   :  { %467 = vmatpush1.bf16.msra.mxu0 %v2022_v48 }
  0x40   :  { %562 = vmatprep.subr.bf16.mxu0 %v1921_v14  ;;  %1514 = vmatmul.mubr.bf16.vlgmr.msra.gmra.mrb[8].mxu1 %v1861_v51 }
  0x41   :  { %1518 = vmatpush3.bf16.msra.mxu1 %v1959_v31  ;;  %1533 = vmatprep.mubr.msk.bf16.mxu1 %vm1860_vm2, %v2425_v25 }
  0x42   :  { %485 = vmatmul.mubr.bf16.vlgmr.msra.gmra.mrb[16].mxu0 %v1861_v51  ;;  %1519 = vmatprep.subr.bf16.mxu1 %v2425_v25 }
  0x43   :  { %563 = vmatpush1.bf16.msra.mxu0 %v1923_v16  ;;  %594 = vmatprep.mubr.bf16.mxu0 %v2423_v3 }
  0x44   :  { %564 = vmatprep.subr.bf16.mxu0 %v1934_v20 }
  0x45   :  { %1520 = vmatpush3.bf16.msra.mxu1 %v1971_v34 }
  0x46   :  { %1521 = vmatprep.subr.bf16.mxu1 %v2425_v25 }
  0x47   :  { %565 = vmatpush1.bf16.msra.mxu0 %v1947_v26 }
  0x48   :  { %566 = vmatprep.subr.bf16.mxu0 %v1951_v28 }
  0x49   :  { %1522 = vmatpush3.bf16.msra.mxu1 %v1982_v38 }
  0x4a   :  { %1523 = vmatprep.subr.bf16.mxu1 %v2425_v25 }
  0x4b   :  { %567 = vmatpush1.bf16.msra.mxu0 %v1954_v29 }
  0x4c   :  { %568 = vmatprep.subr.bf16.mxu0 %v1957_v30 }
  0x4d   :  { %1524 = vmatpush3.bf16.msra.mxu1 %v1995_v41 }
  0x4e   :  { %1525 = vmatprep.subr.bf16.mxu1 %v2425_v25 }
  0x4f   :  { %569 = vmatpush1.bf16.msra.mxu0 %v1974_v35 }
  0x50   :  { %570 = vmatprep.subr.bf16.mxu0 %v1978_v36 }
  0x51   :  { %1526 = vmatpush3.bf16.msra.mxu1 %v2007_v44 }
  0x52   :  { %1527 = vmatprep.subr.bf16.mxu1 %v2425_v25 }
  0x53   :  { %571 = vmatpush1.bf16.msra.mxu0 %v1989_v39 }
  0x54   :  { %572 = vmatprep.subr.bf16.mxu0 %v1992_v40 }
  0x55   :  { %1528 = vmatpush3.bf16.msra.mxu1 %v2017_v47 }
  0x56   :  { %1529 = vmatprep.subr.bf16.mxu1 %v2425_v25 }
  0x57   :  { %573 = vmatpush1.bf16.msra.mxu0 %v2000_v42 }
  0x58   :  { %574 = vmatprep.subr.bf16.mxu0 %v2004_v43 }
  0x59   :  { %1530 = vmatpush3.bf16.msra.mxu1 %v2027_v49 }
  0x5a   :  { %1531 = vmatprep.subr.bf16.mxu1 %v2425_v25 }
  0x5b   :  { %575 = vmatpush1.bf16.msra.mxu0 %v2011_v45 }
  0x5c   :  { %576 = vmatprep.subr.bf16.mxu0 %v2014_v46 }
  0x5d   :  { %1532 = vmatpush3.bf16.msra.mxu1 %v2032_v50 }
  0x5e   :  { %1537 = vmatprep.subr.bf16.mxu1 %v2425_v25 }
  0x5f   :  { %577 = vmatpush1.bf16.msra.mxu0 %v2022_v48 }
  0x60   :  { %674 = vmatprep.subr.bf16.mxu0 %v1921_v14 }
  0xf3   :  { %v1491_v0 = vpop.f32.mrb[0].mxu1 }
  0xf4   :  { %v2083_v5 = vadd.f32 %v1491_v0, %v67_v58  ;;  %v218_v6 = vpop.f32.mrb[1].mxu1 }
  0xf5   :  { %v145_v59 = vpop.f32.mrb[0].mxu0  ;;  %v2087_v8 = vadd.f32 %v218_v6, %v67_v58  ;;  %v1492_v9 = vpop.f32.mrb[2].mxu1 }
  0xf6   :  { %v146_v60 = vadd.f32 %v145_v59, %v59_v56  ;;  %v147_v61 = vpop.f32.mrb[1].mxu0  ;;  %v2089_v10 = vadd.f32 %v1492_v9, %v67_v58  ;;  %v221_v11 = vpop.f32.mrb[3].mxu1 }
  0xf7   :  { %v148_v62 = vadd.f32 %v147_v61, %v63_v57  ;;  %v149_v63 = vpop.f32.mrb[2].mxu0  ;;  %v2091_v12 = vadd.f32 %v221_v11, %v67_v58 }
  0xf8   :  { %v2081_v1 = vadd.f32 %v149_v63, %v59_v56  ;;  %v151_v2 = vpop.f32.mrb[3].mxu0 }
  0xf9   :  { %v2085_v7 = vadd.f32 %v151_v2, %v63_v57 }
  0xfb   :  { %v1495_v23 = vpop.f32.mrb[4].mxu1 }
  0xfc   :  { %v2101_v27 = vadd.f32 %v1495_v23, %v67_v58  ;;  %v234_v32 = vpop.f32.mrb[5].mxu1 }
  0xfd   :  { %v155_v13 = vpop.f32.mrb[4].mxu0  ;;  %v2103_v33 = vadd.f32 %v234_v32, %v67_v58  ;;  %v1496_v37 = vpop.f32.mrb[6].mxu1 }
  0xfe   :  { %v2093_v15 = vadd.f32 %v155_v13, %v59_v56  ;;  %v157_v17 = vpop.f32.mrb[5].mxu0  ;;  %2428 = vst [vmem:[#allocation10_spill] sm:$0xff] %v2101_v27  ;;  %v2105_v51 = vadd.f32 %v1496_v37, %v67_v58  ;;  %v237_v53 = vpop.f32.mrb[7].mxu1 }
  0xff   :  { %v2095_v18 = vadd.f32 %v157_v17, %v63_v57  ;;  %v159_v19 = vpop.f32.mrb[6].mxu0  ;;  %v2107_v59 = vadd.f32 %v237_v53, %v67_v58  ;;  %v305_v58 = vld [vmem:[%s2421_s4] sm:$0x7]  ;;  %s1862_s4 = smov [#allocation7]  }
 0x100   :  { %v2097_v21 = vadd.f32 %v159_v19, %v59_v56  ;;  %v161_v22 = vpop.f32.mrb[7].mxu0  ;;  %2429 = vst [vmem:[#allocation11_spill] sm:$0xff] %v2105_v51  ;;  %s1349_s25 = sshll.u32 %s1862_s4, 4  ;;  %s1350_s25 = int_to_ptr.vmem [resolvable:$true] %s1349_s25 }
 0x101   :  { %v2099_v24 = vadd.f32 %v161_v22, %v63_v57  ;;  %s1828_s26 = scalar_lea.vmem %s1350_s25, 512  ;;  %p1833_p9 = scmp.lt.s32.totalorder %s1350_s25, %s1350_s25 }
 0x102   :  { %p1829_p8 = scmp.ne.s32.totalorder %s1350_s25, %s1828_s26  ;;  %p1834_p10 = scmp.lt.s32.totalorder %s1828_s26, %s1828_s26 }
 0x104   :  { %p1835_p11 = por %p1834_p10, %p1833_p9 }
 0x105   :  { %v165_v61 = vpop.f32.mrb[8].mxu0 }
 0x106   :  { %v2109_v63 = vadd.f32 %v165_v61, %v59_v56  ;;  %v167_v0 = vpop.f32.mrb[9].mxu0  ;;  %p1836_p12 = pnand %p1835_p11, %p1829_p8 }
 0x107   :  { %v2111_v2 = vadd.f32 %v167_v0, %v63_v57  ;;  %v169_v6 = vpop.f32.mrb[10].mxu0  ;;  %v2128_v0 = vrot.slane %v305_v58, %v58_v52 }
 0x108   :  { %v2113_v9 = vadd.f32 %v169_v6, %v59_v56  ;;  %v171_v11 = vpop.f32.mrb[11].mxu0  ;;  %v2130_v6 = vrot.slane %v305_v58, %v62_v54 }
 0x109   :  { %v2115_v13 = vadd.f32 %v171_v11, %v63_v57 }
 0x10d   :  { %v175_v17 = vpop.f32.mrb[12].mxu0 }
 0x10e   :  { %v2117_v19 = vadd.f32 %v175_v17, %v59_v56  ;;  %v177_v22 = vpop.f32.mrb[13].mxu0 }
 0x10f   :  { %v2122_v23 = vadd.f32 %v177_v22, %v63_v57  ;;  %v179_v32 = vpop.f32.mrb[14].mxu0 }
 0x110   :  { %v2124_v37 = vadd.f32 %v179_v32, %v59_v56  ;;  %v181_v53 = vpop.f32.mrb[15].mxu0 }
 0x111   :  { %2430 = vst [vmem:[#allocation12_spill] sm:$0xff] %v2122_v23  ;;  %v2126_v61 = vadd.f32 %v181_v53, %v63_v57 }
 0x112   :  { %2431 = vst [vmem:[#allocation13_spill] sm:$0xff] %v2124_v37 }
 0x113   :  { %2432 = vst [vmem:[#allocation14_spill] sm:$0xff] %v2126_v61  ;;  %v527_v56 = vpop.f32.mrb[8].mxu1 }
 0x114   :  { %v1515_v32 = vpop.f32.mrb[9].mxu1 }
 0x115   :  { %v486_v11 = vpop.f32.mrb[16].mxu0  ;;  %v530_v57 = vpop.f32.mrb[10].mxu1 }
 0x116   :  { %v487_v17 = vadd.f32 %v486_v11, %v2128_v0  ;;  %v488_v3 = vpop.f32.mrb[17].mxu0  ;;  %v1516_v53 = vpop.f32.mrb[11].mxu1  ;;  %v2433_v11 = vsub.s32 2, %v1908_v4 }
 0x117   :  { %v489_v25 = vadd.f32 %v488_v3, %v2130_v6  ;;  %v490_v55 = vpop.f32.mrb[18].mxu0 }
 0x118   :  { %v536_v51 = vadd.f32 %v487_v17, %v146_v60  ;;  %v491_v22 = vpop.f32.mrb[19].mxu0  ;;  %v2136_v37 = vrot.slane %v305_v58, %v2433_v11  ;;  %v2435_v58 = vmov 0  }
 0x119   :  { %v543_v27 = vadd.f32 %v489_v25, %v148_v62 }
 0x11a   :  { %v1394_v23 = vmul.f32 -1.442695, %v536_v51  ;;  %v528_v60 = vadd.f32 %v527_v56, %v2136_v37 }
 0x11b   :  { %v1395_v52 = vmul.f32 -1.442695, %v543_v27 }
 0x11c   :  { %1702 = vpow2.f32 %v1394_v23 }
 0x11d   :  { %1704 = vpow2.f32 %v1395_v52 }
 0x126   :  { %v1703_v54 = vpop.eup %1702 }
 0x127   :  { %v540_v61 = vadd.f32 1.0, %v1703_v54  ;;  %v1705_v3 = vpop.eup %1704 }
 0x128   :  { %v547_v55 = vadd.f32 1.0, %v1705_v3 }
 0x129   :  { %1706 = vrcp.f32 %v540_v61 }
 0x12a   :  { %1708 = vrcp.f32 %v547_v55 }
 0x133   :  { %v1707_v25 = vpop.eup %1706 }
 0x134   :  { %v550_v62 = vmul.f32 %v1707_v25, %v528_v60  ;;  %v1709_v23 = vpop.eup %1708 }
 0x135   :  { %v553_v27 = vsub.f32 1.0, %v1709_v23  ;;  %v555_v32 = vmul.f32 0.0, %v1709_v23 }
 0x136   :  { %v551_v51 = vadd.f32 %v550_v62, %v2087_v8  ;;  %v2434_v8 = vmov 0.0  }
 0x138   :  { %1710 = vtanh.f32 %v551_v51 }
 0x142   :  { %v1711_v17 = vpop.eup %1710 }
 0x143   :  { %v554_v22 = vmul.f32 %v1711_v17, %v553_v27 }
 0x145   :  { %v2140_v61 = vadd.f32 %v555_v32, %v554_v22 }
 0x147   :  { %v558_v4 = vpack.c.bf16 %v2140_v61, %v2140_v61 }
 0x149   :  { %559 = vst [vmem:[#allocation7] sm:$0xf] %v558_v4  ;;  %595 = vmatmul.mubr.bf16.vlgmr.msra.gmra.mrb[20].mxu0 %v558_v4  ;;  %1534 = vmatmul.mubr.bf16.vlgmr.msra.gmra.mrb[12].mxu1 %v558_v4 }
 0x14a   :  { %675 = vmatpush1.bf16.msra.mxu0 %v1923_v16  ;;  %1538 = vmatpush3.bf16.msra.mxu1 %v1959_v31 }
 0x14b   :  { %676 = vmatprep.subr.bf16.mxu0 %v1934_v20  ;;  %1539 = vmatprep.subr.bf16.mxu1 %v2434_v8 }
 0x14c   :  { %706 = vmatprep.mubr.bf16.mxu0 %v2435_v58  ;;  %1553 = vmatprep.mubr.msk.bf16.mxu1 %vm1860_vm2, %v2434_v8 }
 0x14e   :  { %677 = vmatpush1.bf16.msra.mxu0 %v1947_v26  ;;  %1540 = vmatpush3.bf16.msra.mxu1 %v1971_v34 }
 0x14f   :  { %678 = vmatprep.subr.bf16.mxu0 %v1951_v28  ;;  %1541 = vmatprep.subr.bf16.mxu1 %v2434_v8 }
 0x152   :  { %679 = vmatpush1.bf16.msra.mxu0 %v1954_v29  ;;  %1542 = vmatpush3.bf16.msra.mxu1 %v1982_v38 }
 0x153   :  { %680 = vmatprep.subr.bf16.mxu0 %v1957_v30  ;;  %1543 = vmatprep.subr.bf16.mxu1 %v2434_v8 }
 0x156   :  { %681 = vmatpush1.bf16.msra.mxu0 %v1974_v35  ;;  %1544 = vmatpush3.bf16.msra.mxu1 %v1995_v41 }
 0x157   :  { %682 = vmatprep.subr.bf16.mxu0 %v1978_v36  ;;  %1545 = vmatprep.subr.bf16.mxu1 %v2434_v8 }
 0x15a   :  { %683 = vmatpush1.bf16.msra.mxu0 %v1989_v39  ;;  %1546 = vmatpush3.bf16.msra.mxu1 %v2007_v44 }
 0x15b   :  { %684 = vmatprep.subr.bf16.mxu0 %v1992_v40  ;;  %1547 = vmatprep.subr.bf16.mxu1 %v2434_v8 }
 0x15e   :  { %685 = vmatpush1.bf16.msra.mxu0 %v2000_v42  ;;  %1548 = vmatpush3.bf16.msra.mxu1 %v2017_v47 }
 0x15f   :  { %686 = vmatprep.subr.bf16.mxu0 %v2004_v43  ;;  %1549 = vmatprep.subr.bf16.mxu1 %v2434_v8 }
 0x162   :  { %687 = vmatpush1.bf16.msra.mxu0 %v2011_v45  ;;  %1550 = vmatpush3.bf16.msra.mxu1 %v2027_v49 }
 0x163   :  { %688 = vmatprep.subr.bf16.mxu0 %v2014_v46  ;;  %1551 = vmatprep.subr.bf16.mxu1 %v2434_v8 }
 0x166   :  { %689 = vmatpush1.bf16.msra.mxu0 %v2022_v48  ;;  %1552 = vmatpush3.bf16.msra.mxu1 %v2032_v50 }
 0x167   :  { %786 = vmatprep.subr.bf16.mxu0 %v1921_v14  ;;  %1557 = vmatprep.subr.bf16.mxu1 %v2434_v8 }
 0x21c   :  { %v596_v56 = vpop.f32.mrb[20].mxu0  ;;  %v637_v57 = vpop.f32.mrb[12].mxu1 }
 0x21d   :  { %v597_v53 = vadd.f32 %v596_v56, %v2128_v0  ;;  %v598_v52 = vpop.f32.mrb[21].mxu0  ;;  %v1535_v54 = vpop.f32.mrb[13].mxu1  ;;  %v638_v56 = vadd.f32 %v637_v57, %v2136_v37 }
 0x21e   :  { %v599_v11 = vadd.f32 %v598_v52, %v2130_v6  ;;  %v600_v3 = vpop.f32.mrb[22].mxu0  ;;  %v640_v55 = vpop.f32.mrb[14].mxu1 }
 0x21f   :  { %v647_v60 = vadd.f32 %v597_v53, %v2081_v1  ;;  %v601_v25 = vpop.f32.mrb[23].mxu0  ;;  %v1536_v62 = vpop.f32.mrb[15].mxu1 }
 0x220   :  { %v654_v51 = vadd.f32 %v599_v11, %v2085_v7 }
 0x221   :  { %v1396_v23 = vmul.f32 -1.442695, %v647_v60 }
 0x222   :  { %v1397_v27 = vmul.f32 -1.442695, %v654_v51 }
 0x223   :  { %1712 = vpow2.f32 %v1396_v23 }
 0x224   :  { %1714 = vpow2.f32 %v1397_v27 }
 0x22d   :  { %v1713_v17 = vpop.eup %1712 }
 0x22e   :  { %v651_v22 = vadd.f32 1.0, %v1713_v17  ;;  %v1715_v32 = vpop.eup %1714 }
 0x22f   :  { %v658_v4 = vadd.f32 1.0, %v1715_v32 }
 0x230   :  { %1716 = vrcp.f32 %v651_v22 }
 0x231   :  { %1718 = vrcp.f32 %v658_v4 }
 0x23a   :  { %v1717_v52 = vpop.eup %1716 }
 0x23b   :  { %v661_v54 = vmul.f32 %v1717_v52, %v638_v56  ;;  %v1719_v53 = vpop.eup %1718 }
 0x23c   :  { %v664_v3 = vsub.f32 1.0, %v1719_v53  ;;  %v666_v55 = vmul.f32 %v1719_v53, %v2140_v61 }
 0x23d   :  { %v662_v1 = vadd.f32 %v661_v54, %v2091_v12 }
 0x23f   :  { %1720 = vtanh.f32 %v662_v1 }
 0x249   :  { %v1721_v7 = vpop.eup %1720 }
 0x24a   :  { %v665_v11 = vmul.f32 %v1721_v7, %v664_v3 }
 0x24c   :  { %v2186_v60 = vadd.f32 %v666_v55, %v665_v11 }
 0x24e   :  { %v669_v25 = vpack.c.bf16 %v2186_v60, %v2186_v60 }
 0x250   :  { %671 = vst [vmem:[#allocation7 + $0x4] sm:$0xf] %v669_v25  ;;  %707 = vmatmul.mubr.bf16.vlgmr.msra.gmra.mrb[24].mxu0 %v669_v25  ;;  %1554 = vmatmul.mubr.bf16.vlgmr.msra.gmra.mrb[16].mxu1 %v669_v25 }
 0x251   :  { %787 = vmatpush1.bf16.msra.mxu0 %v1923_v16  ;;  %1558 = vmatpush3.bf16.msra.mxu1 %v1959_v31 }
 0x252   :  { %788 = vmatprep.subr.bf16.mxu0 %v1934_v20  ;;  %1559 = vmatprep.subr.bf16.mxu1 %v2434_v8 }
 0x253   :  { %818 = vmatprep.mubr.bf16.mxu0 %v2435_v58  ;;  %1573 = vmatprep.mubr.msk.bf16.mxu1 %vm1860_vm2, %v2434_v8 }
 0x255   :  { %789 = vmatpush1.bf16.msra.mxu0 %v1947_v26  ;;  %1560 = vmatpush3.bf16.msra.mxu1 %v1971_v34 }
 0x256   :  { %790 = vmatprep.subr.bf16.mxu0 %v1951_v28  ;;  %1561 = vmatprep.subr.bf16.mxu1 %v2434_v8 }
 0x259   :  { %791 = vmatpush1.bf16.msra.mxu0 %v1954_v29  ;;  %1562 = vmatpush3.bf16.msra.mxu1 %v1982_v38 }
 0x25a   :  { %792 = vmatprep.subr.bf16.mxu0 %v1957_v30  ;;  %1563 = vmatprep.subr.bf16.mxu1 %v2434_v8 }
 0x25d   :  { %793 = vmatpush1.bf16.msra.mxu0 %v1974_v35  ;;  %1564 = vmatpush3.bf16.msra.mxu1 %v1995_v41 }
 0x25e   :  { %794 = vmatprep.subr.bf16.mxu0 %v1978_v36  ;;  %1565 = vmatprep.subr.bf16.mxu1 %v2434_v8 }
 0x261   :  { %795 = vmatpush1.bf16.msra.mxu0 %v1989_v39  ;;  %1566 = vmatpush3.bf16.msra.mxu1 %v2007_v44 }
 0x262   :  { %796 = vmatprep.subr.bf16.mxu0 %v1992_v40  ;;  %1567 = vmatprep.subr.bf16.mxu1 %v2434_v8 }
 0x265   :  { %797 = vmatpush1.bf16.msra.mxu0 %v2000_v42  ;;  %1568 = vmatpush3.bf16.msra.mxu1 %v2017_v47 }
 0x266   :  { %798 = vmatprep.subr.bf16.mxu0 %v2004_v43  ;;  %1569 = vmatprep.subr.bf16.mxu1 %v2434_v8 }
 0x269   :  { %799 = vmatpush1.bf16.msra.mxu0 %v2011_v45  ;;  %1570 = vmatpush3.bf16.msra.mxu1 %v2027_v49 }
 0x26a   :  { %800 = vmatprep.subr.bf16.mxu0 %v2014_v46  ;;  %1571 = vmatprep.subr.bf16.mxu1 %v2434_v8 }
 0x26d   :  { %801 = vmatpush1.bf16.msra.mxu0 %v2022_v48  ;;  %1572 = vmatpush3.bf16.msra.mxu1 %v2032_v50 }
 0x26e   :  { %898 = vmatprep.subr.bf16.mxu0 %v1921_v14  ;;  %1577 = vmatprep.subr.bf16.mxu1 %v2434_v8 }
 0x323   :  { %v708_v12 = vpop.f32.mrb[24].mxu0  ;;  %v749_v61 = vpop.f32.mrb[16].mxu1 }
 0x324   :  { %v709_v57 = vadd.f32 %v708_v12, %v2128_v0  ;;  %v710_v62 = vpop.f32.mrb[25].mxu0  ;;  %v1555_v51 = vpop.f32.mrb[17].mxu1  ;;  %v750_v11 = vadd.f32 %v749_v61, %v2136_v37 }
 0x325   :  { %v711_v23 = vadd.f32 %v710_v62, %v2130_v6  ;;  %v712_v27 = vpop.f32.mrb[26].mxu0  ;;  %v752_v17 = vpop.f32.mrb[18].mxu1 }
 0x326   :  { %v759_v22 = vadd.f32 %v709_v57, %v2093_v15  ;;  %v713_v32 = vpop.f32.mrb[27].mxu0  ;;  %v1556_v4 = vpop.f32.mrb[19].mxu1 }
 0x327   :  { %v766_v56 = vadd.f32 %v711_v23, %v2095_v18 }
 0x328   :  { %v1398_v52 = vmul.f32 -1.442695, %v759_v22 }
 0x329   :  { %v1399_v54 = vmul.f32 -1.442695, %v766_v56 }
 0x32a   :  { %1722 = vpow2.f32 %v1398_v52 }
 0x32b   :  { %1724 = vpow2.f32 %v1399_v54 }
 0x334   :  { %v1723_v1 = vpop.eup %1722 }
 0x335   :  { %v763_v53 = vadd.f32 1.0, %v1723_v1  ;;  %v1725_v3 = vpop.eup %1724 }
 0x336   :  { %v770_v7 = vadd.f32 1.0, %v1725_v3 }
 0x337   :  { %1726 = vrcp.f32 %v763_v53 }
 0x338   :  { %1728 = vrcp.f32 %v770_v7 }
 0x341   :  { %v1727_v55 = vpop.eup %1726 }
 0x342   :  { %v773_v25 = vmul.f32 %v1727_v55, %v750_v11  ;;  %v1729_v12 = vpop.eup %1728 }
 0x343   :  { %v776_v57 = vsub.f32 1.0, %v1729_v12  ;;  %v778_v51 = vmul.f32 %v1729_v12, %v2186_v60 }
 0x344   :  { %v774_v15 = vadd.f32 %v773_v25, %v2083_v5 }
 0x346   :  { %1730 = vtanh.f32 %v774_v15 }
 0x350   :  { %v1731_v18 = vpop.eup %1730 }
 0x351   :  { %v777_v62 = vmul.f32 %v1731_v18, %v776_v57 }
 0x353   :  { %v2232_v23 = vadd.f32 %v778_v51, %v777_v62 }
 0x355   :  { %v781_v27 = vpack.c.bf16 %v2232_v23, %v2232_v23 }
 0x357   :  { %783 = vst [vmem:[#allocation7 + $0x8] sm:$0xf] %v781_v27  ;;  %819 = vmatmul.mubr.bf16.vlgmr.msra.gmra.mrb[28].mxu0 %v781_v27  ;;  %1574 = vmatmul.mubr.bf16.vlgmr.msra.gmra.mrb[20].mxu1 %v781_v27 }
 0x358   :  { %899 = vmatpush1.bf16.msra.mxu0 %v1923_v16  ;;  %1578 = vmatpush3.bf16.msra.mxu1 %v1959_v31 }
 0x359   :  { %900 = vmatprep.subr.bf16.mxu0 %v1934_v20  ;;  %1579 = vmatprep.subr.bf16.mxu1 %v2434_v8 }
 0x35a   :  { %930 = vmatprep.mubr.bf16.mxu0 %v2435_v58  ;;  %1593 = vmatprep.mubr.msk.bf16.mxu1 %vm1860_vm2, %v2434_v8 }
 0x35c   :  { %901 = vmatpush1.bf16.msra.mxu0 %v1947_v26  ;;  %1580 = vmatpush3.bf16.msra.mxu1 %v1971_v34 }
 0x35d   :  { %902 = vmatprep.subr.bf16.mxu0 %v1951_v28  ;;  %1581 = vmatprep.subr.bf16.mxu1 %v2434_v8 }
 0x360   :  { %903 = vmatpush1.bf16.msra.mxu0 %v1954_v29  ;;  %1582 = vmatpush3.bf16.msra.mxu1 %v1982_v38 }
 0x361   :  { %904 = vmatprep.subr.bf16.mxu0 %v1957_v30  ;;  %1583 = vmatprep.subr.bf16.mxu1 %v2434_v8 }
 0x364   :  { %905 = vmatpush1.bf16.msra.mxu0 %v1974_v35  ;;  %1584 = vmatpush3.bf16.msra.mxu1 %v1995_v41 }
 0x365   :  { %906 = vmatprep.subr.bf16.mxu0 %v1978_v36  ;;  %1585 = vmatprep.subr.bf16.mxu1 %v2434_v8 }
 0x368   :  { %907 = vmatpush1.bf16.msra.mxu0 %v1989_v39  ;;  %1586 = vmatpush3.bf16.msra.mxu1 %v2007_v44 }
 0x369   :  { %908 = vmatprep.subr.bf16.mxu0 %v1992_v40  ;;  %1587 = vmatprep.subr.bf16.mxu1 %v2434_v8 }
 0x36c   :  { %909 = vmatpush1.bf16.msra.mxu0 %v2000_v42  ;;  %1588 = vmatpush3.bf16.msra.mxu1 %v2017_v47 }
 0x36d   :  { %910 = vmatprep.subr.bf16.mxu0 %v2004_v43  ;;  %1589 = vmatprep.subr.bf16.mxu1 %v2434_v8 }
 0x370   :  { %911 = vmatpush1.bf16.msra.mxu0 %v2011_v45  ;;  %1590 = vmatpush3.bf16.msra.mxu1 %v2027_v49 }
 0x371   :  { %912 = vmatprep.subr.bf16.mxu0 %v2014_v46  ;;  %1591 = vmatprep.subr.bf16.mxu1 %v2434_v8 }
 0x374   :  { %913 = vmatpush1.bf16.msra.mxu0 %v2022_v48  ;;  %1592 = vmatpush3.bf16.msra.mxu1 %v2032_v50 }
 0x375   :  { %1010 = vmatprep.subr.bf16.mxu0 %v1921_v14  ;;  %1597 = vmatprep.subr.bf16.mxu1 %v2434_v8 }
 0x42a   :  { %v820_v5 = vpop.f32.mrb[28].mxu0  ;;  %v861_v60 = vpop.f32.mrb[20].mxu1 }
 0x42b   :  { %v821_v61 = vadd.f32 %v820_v5, %v2128_v0  ;;  %v822_v17 = vpop.f32.mrb[29].mxu0  ;;  %v1575_v22 = vpop.f32.mrb[21].mxu1  ;;  %v862_v12 = vadd.f32 %v861_v60, %v2136_v37 }
 0x42c   :  { %v823_v32 = vadd.f32 %v822_v17, %v2130_v6  ;;  %v824_v4 = vpop.f32.mrb[30].mxu0  ;;  %v864_v56 = vpop.f32.mrb[22].mxu1 }
 0x42d   :  { %v871_v52 = vadd.f32 %v821_v61, %v2097_v21  ;;  %v825_v54 = vpop.f32.mrb[31].mxu0  ;;  %v1576_v1 = vpop.f32.mrb[23].mxu1 }
 0x42e   :  { %v878_v53 = vadd.f32 %v823_v32, %v2099_v24 }
 0x42f   :  { %v1400_v3 = vmul.f32 -1.442695, %v871_v52 }
 0x430   :  { %v1401_v7 = vmul.f32 -1.442695, %v878_v53 }
 0x431   :  { %1732 = vpow2.f32 %v1400_v3 }
 0x432   :  { %1734 = vpow2.f32 %v1401_v7 }
 0x43b   :  { %v1733_v11 = vpop.eup %1732 }
 0x43c   :  { %v875_v55 = vadd.f32 1.0, %v1733_v11  ;;  %v1735_v25 = vpop.eup %1734 }
 0x43d   :  { %v882_v15 = vadd.f32 1.0, %v1735_v25 }
 0x43e   :  { %1736 = vrcp.f32 %v875_v55 }
 0x43f   :  { %1738 = vrcp.f32 %v882_v15 }
 0x448   :  { %v1737_v57 = vpop.eup %1736 }
 0x449   :  { %v885_v18 = vmul.f32 %v1737_v57, %v862_v12  ;;  %v1739_v62 = vpop.eup %1738 }
 0x44a   :  { %v888_v51 = vsub.f32 1.0, %v1739_v62  ;;  %v890_v5 = vmul.f32 %v1739_v62, %v2232_v23 }
 0x44b   :  { %v886_v21 = vadd.f32 %v885_v18, %v2089_v10 }
 0x44d   :  { %1740 = vtanh.f32 %v886_v21 }
 0x457   :  { %v1741_v24 = vpop.eup %1740 }
 0x458   :  { %v889_v27 = vmul.f32 %v1741_v24, %v888_v51  ;;  %v2328_v24 = vld [vmem:[#allocation4] ss:$12 sps:$4 sm:$0xff]  }
 0x45a   :  { %v2278_v61 = vadd.f32 %v890_v5, %v889_v27  ;;  %v2339_v27 = vld [vmem:[#allocation4 + $0x18] ss:$12 sps:$4 sm:$0xff]  }
 0x45c   :  { %v893_v17 = vpack.c.bf16 %v2278_v61, %v2278_v61 }
 0x45e   :  { %895 = vst [vmem:[#allocation7 + $0xc] sm:$0xf] %v893_v17  ;;  %931 = vmatmul.mubr.bf16.vlgmr.msra.gmra.mrb[32].mxu0 %v893_v17  ;;  %1594 = vmatmul.mubr.bf16.vlgmr.msra.gmra.mrb[24].mxu1 %v893_v17 }
 0x45f   :  { %1011 = vmatpush1.bf16.msra.mxu0 %v1923_v16  ;;  %1598 = vmatpush3.bf16.msra.mxu1 %v1959_v31 }
 0x460   :  { %1012 = vmatprep.subr.bf16.mxu0 %v1934_v20  ;;  %1599 = vmatprep.subr.bf16.mxu1 %v2434_v8 }
 0x461   :  { %1042 = vmatprep.mubr.bf16.mxu0 %v2435_v58  ;;  %1613 = vmatprep.mubr.msk.bf16.mxu1 %vm1860_vm2, %v2434_v8 }
 0x463   :  { %1013 = vmatpush1.bf16.msra.mxu0 %v1947_v26  ;;  %1600 = vmatpush3.bf16.msra.mxu1 %v1971_v34 }
 0x464   :  { %1014 = vmatprep.subr.bf16.mxu0 %v1951_v28  ;;  %1601 = vmatprep.subr.bf16.mxu1 %v2434_v8 }
 0x467   :  { %1015 = vmatpush1.bf16.msra.mxu0 %v1954_v29  ;;  %1602 = vmatpush3.bf16.msra.mxu1 %v1982_v38 }
 0x468   :  { %1016 = vmatprep.subr.bf16.mxu0 %v1957_v30  ;;  %1603 = vmatprep.subr.bf16.mxu1 %v2434_v8 }
 0x46b   :  { %1017 = vmatpush1.bf16.msra.mxu0 %v1974_v35  ;;  %1604 = vmatpush3.bf16.msra.mxu1 %v1995_v41 }
 0x46c   :  { %1018 = vmatprep.subr.bf16.mxu0 %v1978_v36  ;;  %1605 = vmatprep.subr.bf16.mxu1 %v2434_v8 }
 0x46f   :  { %1019 = vmatpush1.bf16.msra.mxu0 %v1989_v39  ;;  %1606 = vmatpush3.bf16.msra.mxu1 %v2007_v44 }
 0x470   :  { %1020 = vmatprep.subr.bf16.mxu0 %v1992_v40  ;;  %1607 = vmatprep.subr.bf16.mxu1 %v2434_v8 }
 0x473   :  { %1021 = vmatpush1.bf16.msra.mxu0 %v2000_v42  ;;  %1608 = vmatpush3.bf16.msra.mxu1 %v2017_v47 }
 0x474   :  { %1022 = vmatprep.subr.bf16.mxu0 %v2004_v43  ;;  %1609 = vmatprep.subr.bf16.mxu1 %v2434_v8 }
 0x477   :  { %1023 = vmatpush1.bf16.msra.mxu0 %v2011_v45  ;;  %1610 = vmatpush3.bf16.msra.mxu1 %v2027_v49 }
 0x478   :  { %1024 = vmatprep.subr.bf16.mxu0 %v2014_v46  ;;  %1611 = vmatprep.subr.bf16.mxu1 %v2434_v8 }
 0x47b   :  { %1025 = vmatpush1.bf16.msra.mxu0 %v2022_v48  ;;  %1612 = vmatpush3.bf16.msra.mxu1 %v2032_v50 }
 0x47c   :  { %1122 = vmatprep.subr.bf16.mxu0 %v1921_v14  ;;  %1617 = vmatprep.subr.bf16.mxu1 %v2434_v8 }
 0x531   :  { %v932_v16 = vpop.f32.mrb[32].mxu0  ;;  %v973_v20 = vpop.f32.mrb[24].mxu1 }
 0x532   :  { %v933_v26 = vadd.f32 %v932_v16, %v2128_v0  ;;  %v934_v10 = vpop.f32.mrb[33].mxu0  ;;  %v1595_v23 = vpop.f32.mrb[25].mxu1  ;;  %v974_v55 = vadd.f32 %v973_v20, %v2136_v37 }
 0x533   :  { %v935_v60 = vadd.f32 %v934_v10, %v2130_v6  ;;  %v936_v22 = vpop.f32.mrb[34].mxu0  ;;  %v976_v32 = vpop.f32.mrb[26].mxu1 }
 0x534   :  { %v983_v4 = vadd.f32 %v933_v26, %v2109_v63  ;;  %v937_v56 = vpop.f32.mrb[35].mxu0  ;;  %v1596_v52 = vpop.f32.mrb[27].mxu1  ;;  %v1788_v22 = vld [vmem:[#allocation4 + $0x34] ss:$12 sps:$4 sm:$0xff]   ;;  %v1789_v32 = vld [vmem:[#allocation4 + $0x30] ss:$12 sps:$4 sm:$0xff]  }
 0x535   :  { %v990_v54 = vadd.f32 %v935_v60, %v2111_v2  ;;  %v1786_v60 = vld [vmem:[#allocation4 + $0x8] ss:$12 sps:$4 sm:$0xff]   ;;  %v1791_v56 = vld [vmem:[#allocation4 + $0x4c] ss:$12 sps:$4 sm:$0xff]   ;;  %v1793_v52 = vld [vmem:[#allocation4 + $0x50] ss:$12 sps:$4 sm:$0xff]  }
 0x536   :  { %v1402_v1 = vmul.f32 -1.442695, %v983_v4  ;;  %v1790_v4 = vld [vmem:[#allocation4 + $0x38] ss:$12 sps:$4 sm:$0xff]  }
 0x537   :  { %v1403_v14 = vmul.f32 -1.442695, %v990_v54  ;;  %v1794_v54 = vld [vmem:[#allocation4 + $0x64] ss:$12 sps:$4 sm:$0xff]  }
 0x538   :  { %1742 = vpow2.f32 %v1402_v1  ;;  %v1795_v1 = vld [vmem:[#allocation4 + $0x60] ss:$12 sps:$4 sm:$0xff]  }
 0x539   :  { %1744 = vpow2.f32 %v1403_v14  ;;  %v1796_v14 = vld [vmem:[#allocation4 + $0x68] ss:$12 sps:$4 sm:$0xff]  }
 0x542   :  { %v1743_v53 = vpop.eup %1742 }
 0x543   :  { %v987_v3 = vadd.f32 1.0, %v1743_v53  ;;  %v1745_v7 = vpop.eup %1744  ;;  %v1797_v53 = vld [vmem:[#allocation4 + $0x7c] ss:$12 sps:$4 sm:$0xff]  }
 0x544   :  { %v994_v11 = vadd.f32 1.0, %v1745_v7  ;;  %v1799_v7 = vld [vmem:[#allocation4 + $0x80] ss:$12 sps:$4 sm:$0xff]  }
 0x545   :  { %1746 = vrcp.f32 %v987_v3  ;;  %v1798_v3 = vld [vmem:[#allocation4 + $0x78] ss:$12 sps:$4 sm:$0xff]  }
 0x546   :  { %1748 = vrcp.f32 %v994_v11  ;;  %v1800_v11 = vld [vmem:[#allocation4 + $0x94] ss:$12 sps:$4 sm:$0xff]  }
 0x54f   :  { %v1747_v25 = vpop.eup %1746 }
 0x550   :  { %v997_v15 = vmul.f32 %v1747_v25, %v974_v55  ;;  %v1749_v12 = vpop.eup %1748  ;;  %v1801_v55 = vld [vmem:[#allocation4 + $0x90] ss:$12 sps:$4 sm:$0xff]   ;;  %v1802_v25 = vld [vmem:[#allocation4 + $0x98] ss:$12 sps:$4 sm:$0xff]  }
 0x551   :  { %v1000_v57 = vsub.f32 1.0, %v1749_v12  ;;  %v1002_v21 = vmul.f32 %v1749_v12, %v2278_v61  ;;  %v1805_v12 = vld [vmem:[#allocation4 + $0xb0] ss:$12 sps:$4 sm:$0xff]  }
 0x552   :  { %v998_v63 = vadd.f32 %v997_v15, %v2103_v33  ;;  %v2332_v33 = vld [vmem:[#allocation4 + $0x1c] ss:$12 sps:$4 sm:$0xff]   ;;  %v1803_v15 = vld [vmem:[#allocation4 + $0xac] ss:$12 sps:$4 sm:$0xff]  }
 0x554   :  { %1750 = vtanh.f32 %v998_v63  ;;  %v1804_v63 = vld [vmem:[#allocation4 + $0xa8] ss:$12 sps:$4 sm:$0xff]  }
 0x55e   :  { %v1751_v2 = vpop.eup %1750 }
 0x55f   :  { %v1001_v18 = vmul.f32 %v1751_v2, %v1000_v57 }
 0x561   :  { %v2324_v62 = vadd.f32 %v1002_v21, %v1001_v18 }
 0x563   :  { %v1005_v51 = vpack.c.bf16 %v2324_v62, %v2324_v62 }
 0x565   :  { %1007 = vst [vmem:[#allocation7 + $0x10] sm:$0xf] %v1005_v51  ;;  %1043 = vmatmul.mubr.bf16.vlgmr.msra.gmra.mrb[36].mxu0 %v1005_v51  ;;  %1614 = vmatmul.mubr.bf16.vlgmr.msra.gmra.mrb[28].mxu1 %v1005_v51 }
 0x566   :  { %1123 = vmatpush1.bf16.msra.mxu0 %v2328_v24  ;;  %1618 = vmatpush3.bf16.msra.mxu1 %v1959_v31 }
 0x567   :  { %1124 = vmatprep.subr.bf16.mxu0 %v2332_v33  ;;  %1619 = vmatprep.subr.bf16.mxu1 %v2434_v8 }
 0x568   :  { %1154 = vmatprep.mubr.bf16.mxu0 %v2435_v58  ;;  %1633 = vmatprep.mubr.msk.bf16.mxu1 %vm1860_vm2, %v2434_v8 }
 0x56a   :  { %1125 = vmatpush1.bf16.msra.mxu0 %v2339_v27  ;;  %1620 = vmatpush3.bf16.msra.mxu1 %v1971_v34 }
 0x56b   :  { %1126 = vmatprep.subr.bf16.mxu0 %v1951_v28  ;;  %1621 = vmatprep.subr.bf16.mxu1 %v2434_v8  ;;  %v1785_v28 = vld [vmem:[#allocation4 + $0x4] ss:$12 sps:$4 sm:$0xff]  }
 0x56e   :  { %1127 = vmatpush1.bf16.msra.mxu0 %v1954_v29  ;;  %1622 = vmatpush3.bf16.msra.mxu1 %v1982_v38 }
 0x56f   :  { %1128 = vmatprep.subr.bf16.mxu0 %v1957_v30  ;;  %1623 = vmatprep.subr.bf16.mxu1 %v2434_v8 }
 0x572   :  { %1129 = vmatpush1.bf16.msra.mxu0 %v1974_v35  ;;  %1624 = vmatpush3.bf16.msra.mxu1 %v1995_v41 }
 0x573   :  { %1130 = vmatprep.subr.bf16.mxu0 %v1978_v36  ;;  %1625 = vmatprep.subr.bf16.mxu1 %v2434_v8 }
 0x576   :  { %1131 = vmatpush1.bf16.msra.mxu0 %v1989_v39  ;;  %1626 = vmatpush3.bf16.msra.mxu1 %v2007_v44 }
 0x577   :  { %1132 = vmatprep.subr.bf16.mxu0 %v1992_v40  ;;  %1627 = vmatprep.subr.bf16.mxu1 %v2434_v8 }
 0x57a   :  { %1133 = vmatpush1.bf16.msra.mxu0 %v2000_v42  ;;  %1628 = vmatpush3.bf16.msra.mxu1 %v2017_v47 }
 0x57b   :  { %1134 = vmatprep.subr.bf16.mxu0 %v2004_v43  ;;  %1629 = vmatprep.subr.bf16.mxu1 %v2434_v8 }
 0x57e   :  { %1135 = vmatpush1.bf16.msra.mxu0 %v2011_v45  ;;  %1630 = vmatpush3.bf16.msra.mxu1 %v2027_v49 }
 0x57f   :  { %1136 = vmatprep.subr.bf16.mxu0 %v2014_v46  ;;  %1631 = vmatprep.subr.bf16.mxu1 %v2434_v8 }
 0x582   :  { %1137 = vmatpush1.bf16.msra.mxu0 %v2022_v48  ;;  %1632 = vmatpush3.bf16.msra.mxu1 %v2032_v50 }
 0x583   :  { %1234 = vmatprep.subr.bf16.mxu0 %v1785_v28  ;;  %1637 = vmatprep.subr.bf16.mxu1 %v2434_v8 }
 0x638   :  { %v1044_v29 = vpop.f32.mrb[36].mxu0  ;;  %v1085_v30 = vpop.f32.mrb[28].mxu1 }
 0x639   :  { %v1045_v31 = vadd.f32 %v1044_v29, %v2128_v0  ;;  %v1046_v34 = vpop.f32.mrb[37].mxu0  ;;  %v1615_v35 = vpop.f32.mrb[29].mxu1  ;;  %v1086_v50 = vadd.f32 %v1085_v30, %v2136_v37  ;;  %v2436_v30 = vld [vmem:[#allocation12_spill] sm:$0xff] }
 0x63a   :  { %v1047_v36 = vadd.f32 %v1046_v34, %v2130_v6  ;;  %v1048_v38 = vpop.f32.mrb[38].mxu0  ;;  %v1088_v39 = vpop.f32.mrb[30].mxu1 }
 0x63b   :  { %v1095_v40 = vadd.f32 %v1045_v31, %v2113_v9  ;;  %v1049_v41 = vpop.f32.mrb[39].mxu0  ;;  %v1616_v42 = vpop.f32.mrb[31].mxu1 }
 0x63c   :  { %v1102_v43 = vadd.f32 %v1047_v36, %v2115_v13 }
 0x63d   :  { %v1404_v44 = vmul.f32 -1.442695, %v1095_v40 }
 0x63e   :  { %v1405_v45 = vmul.f32 -1.442695, %v1102_v43  ;;  %v2437_v43 = vld [vmem:[#allocation10_spill] sm:$0xff] }
 0x63f   :  { %1752 = vpow2.f32 %v1404_v44 }
 0x640   :  { %1754 = vpow2.f32 %v1405_v45 }
 0x649   :  { %v1753_v46 = vpop.eup %1752 }
 0x64a   :  { %v1099_v47 = vadd.f32 1.0, %v1753_v46  ;;  %v1755_v48 = vpop.eup %1754 }
 0x64b   :  { %v1106_v49 = vadd.f32 1.0, %v1755_v48 }
 0x64c   :  { %1756 = vrcp.f32 %v1099_v47 }
 0x64d   :  { %1758 = vrcp.f32 %v1106_v49 }
 0x656   :  { %v1757_v5 = vpop.eup %1756 }
 0x657   :  { %v1109_v61 = vmul.f32 %v1757_v5, %v1086_v50  ;;  %v1759_v17 = vpop.eup %1758 }
 0x658   :  { %v1112_v16 = vsub.f32 1.0, %v1759_v17  ;;  %v1114_v26 = vmul.f32 %v1759_v17, %v2324_v62 }
 0x659   :  { %v1110_v9 = vadd.f32 %v1109_v61, %v2107_v59  ;;  %v1787_v59 = vld [vmem:[#allocation4 + $0x20] ss:$12 sps:$4 sm:$0xff]  }
 0x65b   :  { %1760 = vtanh.f32 %v1110_v9 }
 0x665   :  { %v1761_v13 = vpop.eup %1760 }
 0x666   :  { %v1113_v20 = vmul.f32 %v1761_v13, %v1112_v16 }
 0x668   :  { %v2375_v10 = vadd.f32 %v1114_v26, %v1113_v20 }
 0x66a   :  { %v1117_v23 = vpack.c.bf16 %v2375_v10, %v2375_v10 }
 0x66c   :  { %1119 = vst [vmem:[#allocation7 + $0x14] sm:$0xf] %v1117_v23  ;;  %1155 = vmatmul.mubr.bf16.vlgmr.msra.gmra.mrb[40].mxu0 %v1117_v23  ;;  %1634 = vmatmul.mubr.bf16.vlgmr.msra.gmra.mrb[32].mxu1 %v1117_v23  ;;  %v2438_v23 = vld [vmem:[#allocation13_spill] sm:$0xff] }
 0x66d   :  { %1235 = vmatpush1.bf16.msra.mxu0 %v2328_v24  ;;  %1638 = vmatpush3.bf16.msra.mxu1 %v1786_v60 }
 0x66e   :  { %1236 = vmatprep.subr.bf16.mxu0 %v2332_v33  ;;  %1639 = vmatprep.subr.bf16.mxu1 %v2434_v8 }
 0x66f   :  { %1266 = vmatprep.mubr.bf16.mxu0 %v2435_v58  ;;  %1653 = vmatprep.mubr.msk.bf16.mxu1 %vm1860_vm2, %v2434_v8  ;;  %v1792_v58 = vld [vmem:[#allocation4 + $0x48] ss:$12 sps:$4 sm:$0xff]  }
 0x671   :  { %1237 = vmatpush1.bf16.msra.mxu0 %v2339_v27  ;;  %1640 = vmatpush3.bf16.msra.mxu1 %v1787_v59 }
 0x672   :  { %1238 = vmatprep.subr.bf16.mxu0 %v1788_v22  ;;  %1641 = vmatprep.subr.bf16.mxu1 %v2434_v8 }
 0x675   :  { %1239 = vmatpush1.bf16.msra.mxu0 %v1789_v32  ;;  %1642 = vmatpush3.bf16.msra.mxu1 %v1790_v4 }
 0x676   :  { %1240 = vmatprep.subr.bf16.mxu0 %v1791_v56  ;;  %1643 = vmatprep.subr.bf16.mxu1 %v2434_v8 }
 0x679   :  { %1241 = vmatpush1.bf16.msra.mxu0 %v1792_v58  ;;  %1644 = vmatpush3.bf16.msra.mxu1 %v1793_v52 }
 0x67a   :  { %1242 = vmatprep.subr.bf16.mxu0 %v1794_v54  ;;  %1645 = vmatprep.subr.bf16.mxu1 %v2434_v8 }
 0x67d   :  { %1243 = vmatpush1.bf16.msra.mxu0 %v1795_v1  ;;  %1646 = vmatpush3.bf16.msra.mxu1 %v1796_v14 }
 0x67e   :  { %1244 = vmatprep.subr.bf16.mxu0 %v1797_v53  ;;  %1647 = vmatprep.subr.bf16.mxu1 %v2434_v8  ;;  %v2440_v53 = vld [vmem:[#allocation11_spill] sm:$0xff] }
 0x681   :  { %1245 = vmatpush1.bf16.msra.mxu0 %v1798_v3  ;;  %1648 = vmatpush3.bf16.msra.mxu1 %v1799_v7 }
 0x682   :  { %1246 = vmatprep.subr.bf16.mxu0 %v1800_v11  ;;  %1649 = vmatprep.subr.bf16.mxu1 %v2434_v8 }
 0x685   :  { %1247 = vmatpush1.bf16.msra.mxu0 %v1801_v55  ;;  %1650 = vmatpush3.bf16.msra.mxu1 %v1802_v25 }
 0x686   :  { %1248 = vmatprep.subr.bf16.mxu0 %v1803_v15  ;;  %1651 = vmatprep.subr.bf16.mxu1 %v2434_v8 }
 0x689   :  { %1249 = vmatpush1.bf16.msra.mxu0 %v1804_v63  ;;  %1652 = vmatpush3.bf16.msra.mxu1 %v1805_v12 }
 0x73f   :  { %v1156_v57 = vpop.f32.mrb[40].mxu0  ;;  %v1197_v2 = vpop.f32.mrb[32].mxu1 }
 0x740   :  { %v1157_v18 = vadd.f32 %v1156_v57, %v2128_v0  ;;  %v1158_v21 = vpop.f32.mrb[41].mxu0  ;;  %v1635_v62 = vpop.f32.mrb[33].mxu1  ;;  %v1198_v40 = vadd.f32 %v1197_v2, %v2136_v37 }
 0x741   :  { %v1159_v51 = vadd.f32 %v1158_v21, %v2130_v6  ;;  %v1160_v24 = vpop.f32.mrb[42].mxu0  ;;  %v1200_v33 = vpop.f32.mrb[34].mxu1 }
 0x742   :  { %v1207_v27 = vadd.f32 %v1157_v18, %v2117_v19  ;;  %v1161_v28 = vpop.f32.mrb[43].mxu0  ;;  %v1636_v29 = vpop.f32.mrb[35].mxu1 }
 0x743   :  { %v1214_v8 = vadd.f32 %v1159_v51, %v2436_v30 }
 0x744   :  { %v1406_v31 = vmul.f32 -1.442695, %v1207_v27 }
 0x745   :  { %v1407_v34 = vmul.f32 -1.442695, %v1214_v8 }
 0x746   :  { %1762 = vpow2.f32 %v1406_v31 }
 0x747   :  { %1764 = vpow2.f32 %v1407_v34 }
 0x750   :  { %v1763_v35 = vpop.eup %1762 }
 0x751   :  { %v1211_v36 = vadd.f32 1.0, %v1763_v35  ;;  %v1765_v38 = vpop.eup %1764 }
 0x752   :  { %v1218_v39 = vadd.f32 1.0, %v1765_v38 }
 0x753   :  { %1766 = vrcp.f32 %v1211_v36 }
 0x754   :  { %1768 = vrcp.f32 %v1218_v39 }
 0x75d   :  { %v1767_v41 = vpop.eup %1766 }
 0x75e   :  { %v1221_v42 = vmul.f32 %v1767_v41, %v1198_v40  ;;  %v1769_v44 = vpop.eup %1768 }
 0x75f   :  { %v1224_v45 = vsub.f32 1.0, %v1769_v44  ;;  %v1226_v48 = vmul.f32 %v1769_v44, %v2375_v10  ;;  %v2439_v10 = vld [vmem:[#allocation14_spill] sm:$0xff] }
 0x760   :  { %v1222_v19 = vadd.f32 %v1221_v42, %v2437_v43 }
 0x762   :  { %1770 = vtanh.f32 %v1222_v19 }
 0x76c   :  { %v1771_v46 = vpop.eup %1770 }
 0x76d   :  { %v1225_v47 = vmul.f32 %v1771_v46, %v1224_v45 }
 0x76f   :  { %v1227_v49 = vadd.f32 %v1226_v48, %v1225_v47 }
 0x771   :  { %v1229_v50 = vpack.c.bf16 %v1227_v49, %v1227_v49 }
 0x773   :  { %1231 = vst [vmem:[#allocation7 + $0x18] sm:$0xf] %v1229_v50  ;;  %1267 = vmatmul.mubr.bf16.vlgmr.msra.gmra.mrb[44].mxu0 %v1229_v50  ;;  %1654 = vmatmul.mubr.bf16.vlgmr.msra.gmra.mrb[36].mxu1 %v1229_v50 }
 0x846   :  { %v1268_v5 = vpop.f32.mrb[44].mxu0  ;;  %v1309_v61 = vpop.f32.mrb[36].mxu1 }
 0x847   :  { %v1269_v9 = vadd.f32 %v1268_v5, %v2128_v0  ;;  %v1270_v17 = vpop.f32.mrb[45].mxu0  ;;  %v1655_v16 = vpop.f32.mrb[37].mxu1  ;;  %v1310_v1 = vadd.f32 %v1309_v61, %v2136_v37 }
 0x848   :  { %v1271_v13 = vadd.f32 %v1270_v17, %v2130_v6  ;;  %v1272_v20 = vpop.f32.mrb[46].mxu0  ;;  %v1312_v26 = vpop.f32.mrb[38].mxu1 }
 0x849   :  { %v1319_v60 = vadd.f32 %v1269_v9, %v2438_v23  ;;  %v1273_v59 = vpop.f32.mrb[47].mxu0  ;;  %v1656_v22 = vpop.f32.mrb[39].mxu1 }
 0x84a   :  { %v1326_v32 = vadd.f32 %v1271_v13, %v2439_v10 }
 0x84b   :  { %v1408_v4 = vmul.f32 -1.442695, %v1319_v60 }
 0x84c   :  { %v1409_v56 = vmul.f32 -1.442695, %v1326_v32 }
 0x84d   :  { %1772 = vpow2.f32 %v1408_v4 }
 0x84e   :  { %1774 = vpow2.f32 %v1409_v56 }
 0x857   :  { %v1773_v58 = vpop.eup %1772 }
 0x858   :  { %v1323_v52 = vadd.f32 1.0, %v1773_v58  ;;  %v1775_v0 = vpop.eup %1774 }
 0x859   :  { %v1330_v54 = vadd.f32 1.0, %v1775_v0 }
 0x85a   :  { %1776 = vrcp.f32 %v1323_v52 }
 0x85b   :  { %1778 = vrcp.f32 %v1330_v54 }
 0x864   :  { %v1777_v6 = vpop.eup %1776 }
 0x865   :  { %v1333_v14 = vmul.f32 %v1777_v6, %v1310_v1  ;;  %v1779_v7 = vpop.eup %1778 }
 0x866   :  { %v1336_v11 = vsub.f32 1.0, %v1779_v7  ;;  %v1338_v15 = vmul.f32 %v1779_v7, %v1227_v49 }
 0x867   :  { %v1334_v3 = vadd.f32 %v1333_v14, %v2440_v53 }
 0x869   :  { %1780 = vtanh.f32 %v1334_v3 }
 0x873   :  { %v1781_v55 = vpop.eup %1780 }
 0x874   :  { %v1337_v25 = vmul.f32 %v1781_v55, %v1336_v11 }
 0x876   :  { %v1339_v63 = vadd.f32 %v1338_v15, %v1337_v25 }
 0x878   :  { %v1341_v12 = vpack.c.bf16 %v1339_v63, %v1339_v63 }
 0x87a   :  { %1343 = vst [vmem:[#allocation7 + $0x1c] sm:$0xf] %v1341_v12 }
 0x87b   :  { %1839 = shalt.err (!%p1836_p12)
}
 0x87c   :  { %s1840_s29 = scalar_lea.hbm %s2422_s5, 512 }
 0x87d   :  { %p1841_p13 = scmp.ne.s32.totalorder %s2422_s5, %s1840_s29  ;;  %p1844_p0 = scmp.lt.u32.totalorder %s1840_s29, %s2422_s5 }
 0x87f   :  { %p1846_p1 = pnand %p1844_p0, %p1841_p13 }
 0x881   :  { %1849 = shalt.err (!%p1846_p1)
}
 0x882   :  { %s1863_s2 = smov 64   ;;  %s1864_s9 = smov 4  }
 0x883   :  { %1355 = dma.vmem_to_hbm [thread:$0]  %s1350_s25, 512, %s2422_s5, [#allocation6], %s1863_s2, %s1863_s2, %s1864_s9  }
 0x884   :  { %1852 = dma.done.wait [#allocation6], 512  }
 0x885   :  { %1853 = vsyncadd [#allocation6], 4294966784 }
 0x886   :  { %1359 = vsyncpa [#allocation5], 1 }
 0x887   :  { %1360 = vsyncpa [#allocation6], 1 }

</bundles_post_ra>
